<compile_context>
chip_gen: v7x
topology: tpu7x:2x2x1
jax: 0.10.0
libtpu: 0.0.40
codegen_flags: <defaults>
</compile_context>

<pallas_src>
import jax
import jax.numpy as jnp
from jax.experimental import pallas as pl
from jax.experimental.pallas import tpu as pltpu

H_OUT = 1000          # logical hidden / output width (matches PyTorch module)
H_PAD = 1024          # lane-dense padded width (8 * 128)
K_IN = 5              # cat([x, mu]) feature width


def _mlp_kernel(x_ref, mu_ref, w1_ref, b1_ref, w2_ref, o_ref):
    # ---- Layer 1: Linear(5 -> H) + bias, Sigmoid -------------------------
    # K=5 is far too small for the MXU (5/128 of the contraction width), so we
    # do it as 5 broadcast FMAs on the otherwise-idle VALU slots. This also
    # fuses the torch.cat([x, mu], dim=1): the concat never materializes.
    x = x_ref[...]                                   # [B, 4]  f32
    mu = mu_ref[...]                                 # [B, 1]  f32
    w1 = w1_ref[...]                                 # [5, H]  f32
    h = b1_ref[...]                                  # [1, H]  f32 (broadcasts)
    h = h + x[:, 0:1] * w1[0:1, :]
    h = h + x[:, 1:2] * w1[1:2, :]
    h = h + x[:, 2:3] * w1[2:3, :]
    h = h + x[:, 3:4] * w1[3:4, :]
    h = h + mu[:, 0:1] * w1[4:5, :]
    h = jax.nn.sigmoid(h)                            # [B, H]  f32

    # ---- Layer 2: Linear(H -> H, bias=False), ReLU -----------------------
    # Native bf16 x bf16 MXU matmul with f32 accumulation. w2 arrives as bf16
    # (halves the dominant HBM DMA); padded rows of w2 are zero so the padded
    # hidden units (sigmoid(0) = 0.5) contribute nothing.
    y = jnp.dot(h.astype(jnp.bfloat16), w2_ref[...],
                preferred_element_type=jnp.float32)  # [B, H] f32
    o_ref[...] = jnp.maximum(y, 0.0)


def prepare_params(w1, b1, w2):
    """One-time padding (1000 -> 1024) and bf16 cast of the big weight.

    w1: [5, 1000] f32, b1: [1000] or [1, 1000] f32, w2: [1000, 1000] f32.
    Returns (w1_p [5,1024] f32, b1_p [1,1024] f32, w2_p [1024,1024] bf16).
    """
    w1_p = jnp.zeros((K_IN, H_PAD), jnp.float32).at[:, :H_OUT].set(
        w1.astype(jnp.float32))
    b1_p = jnp.zeros((1, H_PAD), jnp.float32).at[:, :H_OUT].set(
        b1.reshape(1, -1).astype(jnp.float32))
    # Padded rows AND columns are exactly zero (rows: correctness, cols: sliced).
    w2_p = jnp.zeros((H_PAD, H_PAD), jnp.float32).at[:H_OUT, :H_OUT].set(
        w2.astype(jnp.float32)).astype(jnp.bfloat16)
    return w1_p, b1_p, w2_p


def neural_network2_forward(x, mu, w1_p, b1_p, w2_p):
    """x: [B, 4], mu: [B, 1]; padded params from prepare_params().
    Returns [B, 1000] float32."""
    B = x.shape[0]
    Bp = ((B + 7) // 8) * 8                          # sublane-align batch

    x_p = jnp.zeros((Bp, 4), jnp.float32).at[:B].set(x.astype(jnp.float32))
    mu_p = jnp.zeros((Bp, 1), jnp.float32).at[:B].set(mu.astype(jnp.float32))

    out = pl.pallas_call(
        _mlp_kernel,
        out_shape=jax.ShapeDtypeStruct((Bp, H_PAD), jnp.float32),
        # Full-array blocks; total VMEM footprint ~2.5 MB (w2 bf16 = 2 MB),
        # well inside the default scoped-VMEM budget on v5e/v6e/v7x.
        in_specs=[
            pl.BlockSpec(memory_space=pltpu.VMEM),   # x   [Bp, 4]    f32
            pl.BlockSpec(memory_space=pltpu.VMEM),   # mu  [Bp, 1]    f32
            pl.BlockSpec(memory_space=pltpu.VMEM),   # w1  [5, 1024]  f32
            pl.BlockSpec(memory_space=pltpu.VMEM),   # b1  [1, 1024]  f32
            pl.BlockSpec(memory_space=pltpu.VMEM),   # w2  [1024,1024] bf16
        ],
        out_specs=pl.BlockSpec(memory_space=pltpu.VMEM),
    )(x_p, mu_p, w1_p, b1_p, w2_p)
    return out[:B, :H_OUT]


def init_params(key):
    """Deterministic init mimicking nn.Linear default (uniform +-1/sqrt(fan_in)).
    Returns raw (unpadded, f32) params in [in_features, out_features] layout."""
    k1, k2, k3 = jax.random.split(key, 3)
    in1, out1 = K_IN, H_OUT
    in2, out2 = H_OUT, H_OUT
    bound1 = 1.0 / jnp.sqrt(in1)
    bound2 = 1.0 / jnp.sqrt(in2)
    w1 = jax.random.uniform(k1, (in1, out1), jnp.float32, -bound1, bound1)
    b1 = jax.random.uniform(k2, (1, out1), jnp.float32, -bound1, bound1)
    w2 = jax.random.uniform(k3, (in2, out2), jnp.float32, -bound2, bound2)
    return w1, b1, w2


def reference_forward(x, mu, w1, b1, w2):
    """Pure-JAX f32 reference matching the PyTorch module."""
    z = jnp.concatenate([x, mu], axis=1).astype(jnp.float32)
    h = jax.nn.sigmoid(z @ w1 + b1)
    return jnp.maximum(h @ w2, 0.0)


if __name__ == "__main__":
    key = jax.random.PRNGKey(0)
    kx, kmu, kp = jax.random.split(key, 3)

    B = 8
    x = jax.random.normal(kx, (B, 4), jnp.float32)    # reduced-order coords
    mu = jax.random.normal(kmu, (B, 1), jnp.float32)  # scalar parameter

    w1, b1, w2 = init_params(kp)
    w1_p, b1_p, w2_p = prepare_params(w1, b1, w2)     # pad + bf16 once

    fwd = jax.jit(neural_network2_forward)
    out = fwd(x, mu, w1_p, b1_p, w2_p)
    out = jax.block_until_ready(out)

    # f32 reference; bf16 weights/activations in the big matmul widen the
    # tolerance (~1e-3 typical error over a K=1000 contraction).
    ref = reference_forward(x, mu, w1, b1, w2)
    assert out.shape == (B, H_OUT)
    assert jnp.allclose(out, ref, atol=5e-2, rtol=5e-2)

    print("KERNEL_OK")
</pallas_src>

<mosaic_0001>
module attributes {stable_mosaic.version = 11 : i64} {
  func.func @_mlp_kernel(%arg0: memref<8x4xf32, #tpu.memory_space<vmem>>, %arg1: memref<8x1xf32, #tpu.memory_space<vmem>>, %arg2: memref<5x1024xf32, #tpu.memory_space<vmem>>, %arg3: memref<1x1024xf32, #tpu.memory_space<vmem>>, %arg4: memref<1024x1024xbf16, #tpu.memory_space<vmem>>, %arg5: memref<8x1024xf32, #tpu.memory_space<vmem>>) attributes {dimension_semantics = [], scalar_prefetch = 0 : i64, scratch_operands = 0 : i64, tpu.core_type = #tpu.core_type<tc>} {
    %c0 = arith.constant 0 : index
    %c0_0 = arith.constant 0 : index
    %0 = vector.load %arg0[%c0, %c0_0] : memref<8x4xf32, #tpu.memory_space<vmem>>, vector<8x4xf32>
    %c0_1 = arith.constant 0 : index
    %c0_2 = arith.constant 0 : index
    %1 = vector.load %arg1[%c0_1, %c0_2] : memref<8x1xf32, #tpu.memory_space<vmem>>, vector<8x1xf32>
    %c0_3 = arith.constant 0 : index
    %c0_4 = arith.constant 0 : index
    %2 = vector.load %arg2[%c0_3, %c0_4] : memref<5x1024xf32, #tpu.memory_space<vmem>>, vector<5x1024xf32>
    %c0_5 = arith.constant 0 : index
    %c0_6 = arith.constant 0 : index
    %3 = vector.load %arg3[%c0_5, %c0_6] : memref<1x1024xf32, #tpu.memory_space<vmem>>, vector<1x1024xf32>
    %4 = vector.extract_strided_slice %0 {offsets = [0, 0], sizes = [8, 1], strides = [1, 1]} : vector<8x4xf32> to vector<8x1xf32>
    %5 = vector.extract_strided_slice %2 {offsets = [0, 0], sizes = [1, 1024], strides = [1, 1]} : vector<5x1024xf32> to vector<1x1024xf32>
    %6 = vector.broadcast %4 : vector<8x1xf32> to vector<8x1024xf32>
    %7 = vector.broadcast %5 : vector<1x1024xf32> to vector<8x1024xf32>
    %8 = arith.mulf %6, %7 : vector<8x1024xf32>
    %9 = vector.broadcast %3 : vector<1x1024xf32> to vector<8x1024xf32>
    %10 = arith.addf %9, %8 : vector<8x1024xf32>
    %11 = vector.extract_strided_slice %0 {offsets = [0, 1], sizes = [8, 1], strides = [1, 1]} : vector<8x4xf32> to vector<8x1xf32>
    %12 = vector.extract_strided_slice %2 {offsets = [1, 0], sizes = [1, 1024], strides = [1, 1]} : vector<5x1024xf32> to vector<1x1024xf32>
    %13 = vector.broadcast %11 : vector<8x1xf32> to vector<8x1024xf32>
    %14 = vector.broadcast %12 : vector<1x1024xf32> to vector<8x1024xf32>
    %15 = arith.mulf %13, %14 : vector<8x1024xf32>
    %16 = arith.addf %10, %15 : vector<8x1024xf32>
    %17 = vector.extract_strided_slice %0 {offsets = [0, 2], sizes = [8, 1], strides = [1, 1]} : vector<8x4xf32> to vector<8x1xf32>
    %18 = vector.extract_strided_slice %2 {offsets = [2, 0], sizes = [1, 1024], strides = [1, 1]} : vector<5x1024xf32> to vector<1x1024xf32>
    %19 = vector.broadcast %17 : vector<8x1xf32> to vector<8x1024xf32>
    %20 = vector.broadcast %18 : vector<1x1024xf32> to vector<8x1024xf32>
    %21 = arith.mulf %19, %20 : vector<8x1024xf32>
    %22 = arith.addf %16, %21 : vector<8x1024xf32>
    %23 = vector.extract_strided_slice %0 {offsets = [0, 3], sizes = [8, 1], strides = [1, 1]} : vector<8x4xf32> to vector<8x1xf32>
    %24 = vector.extract_strided_slice %2 {offsets = [3, 0], sizes = [1, 1024], strides = [1, 1]} : vector<5x1024xf32> to vector<1x1024xf32>
    %25 = vector.broadcast %23 : vector<8x1xf32> to vector<8x1024xf32>
    %26 = vector.broadcast %24 : vector<1x1024xf32> to vector<8x1024xf32>
    %27 = arith.mulf %25, %26 : vector<8x1024xf32>
    %28 = arith.addf %22, %27 : vector<8x1024xf32>
    %29 = vector.extract_strided_slice %2 {offsets = [4, 0], sizes = [1, 1024], strides = [1, 1]} : vector<5x1024xf32> to vector<1x1024xf32>
    %30 = vector.broadcast %1 : vector<8x1xf32> to vector<8x1024xf32>
    %31 = vector.broadcast %29 : vector<1x1024xf32> to vector<8x1024xf32>
    %32 = arith.mulf %30, %31 : vector<8x1024xf32>
    %33 = arith.addf %28, %32 : vector<8x1024xf32>
    %34 = arith.negf %33 : vector<8x1024xf32>
    %35 = math.exp %34 : vector<8x1024xf32>
    %cst = arith.constant 1.000000e+00 : f32
    %36 = vector.broadcast %cst : f32 to vector<8x1024xf32>
    %37 = arith.addf %36, %35 : vector<8x1024xf32>
    %38 = arith.divf %36, %37 : vector<8x1024xf32>
    %39 = arith.truncf %38 : vector<8x1024xf32> to vector<8x1024xbf16>
    %c0_7 = arith.constant 0 : index
    %c0_8 = arith.constant 0 : index
    %40 = vector.load %arg4[%c0_7, %c0_8] : memref<1024x1024xbf16, #tpu.memory_space<vmem>>, vector<1024x1024xbf16>
    %cst_9 = arith.constant dense<0.000000e+00> : vector<8x1024xf32>
    %41 = tpu.matmul %39, %40, %cst_9 {dimension_numbers = #tpu.dot_dimension_numbers<[1], [0], [0], [1], [0, 0, 1, 1], [], []>} : vector<8x1024xbf16>, vector<1024x1024xbf16>, vector<8x1024xf32> -> vector<8x1024xf32>
    %cst_10 = arith.constant 0.000000e+00 : f32
    %42 = vector.broadcast %cst_10 : f32 to vector<8x1024xf32>
    %43 = arith.maximumf %41, %42 : vector<8x1024xf32>
    %c0_11 = arith.constant 0 : index
    %c0_12 = arith.constant 0 : index
    %44 = vector.load %arg5[%c0_11, %c0_12] : memref<8x1024xf32, #tpu.memory_space<vmem>>, vector<8x1024xf32>
    tpu.vector_store %arg5[%c0_11, %c0_12], %43 {strides = array<i32>} : memref<8x1024xf32, #tpu.memory_space<vmem>>, vector<8x1024xf32>,
    return
  }
}

</mosaic_0001>

<bundles_post_ra>
// kernel: neural_network2_forward.1
= control target key start
LH: loop header
LB: loop body
LE: loop exit
PB: predicated region body
PF: predicated region fallthrough
CT: control target
= control target key end

     0   :  { %10 = vsyncpa [#allocation3], 0  ;;  %s5248_s0 = inlined_call_operand.vmem [shape: f32[8,4], index: 0, kind: input, shape index: {}]   ;;  %s5249_s1 = inlined_call_operand.vmem [shape: f32[8,1], index: 1, kind: input, shape index: {}]   ;;  %s5250_s2 = inlined_call_operand.hbm [shape: f32[5,1024], index: 2, kind: input, shape index: {}]   ;;  %s5251_s3 = inlined_call_operand.hbm [shape: f32[1,1024], index: 3, kind: input, shape index: {}]   ;;  %s5252_s4 = inlined_call_operand.hbm [shape: bf16[1024,1024], index: 4, kind: input, shape index: {}]   ;;  %s5253_s5 = inlined_call_operand.hbm [shape: f32[8,1024], index: 5, kind: output, shape index: {}]  }
   0x1   :  { %11 = vsyncpa [#allocation6], 0 }
   0x2   :  { %12 = vsyncpa [#allocation4], 0  ;;  %s4898_s18 = smov [#allocation5]   ;;  %s4899_s20 = smov [#allocation2]  }
   0x3   :  { %s33_s19 = sshll.u32 %s4898_s18, 4  ;;  %s23_s21 = sshll.u32 %s4899_s20, 4  ;;  %s34_s19 = int_to_ptr.vmem [resolvable:$true] %s33_s19  ;;  %s24_s21 = int_to_ptr.vmem [resolvable:$true] %s23_s21 }
   0x4   :  { %s4804_s24 = scalar_lea.hbm %s5251_s3, 128 }
   0x5   :  { %p4805_p0 = scmp.ne.s32.totalorder %s5251_s3, %s4804_s24  ;;  %p4808_p1 = scmp.lt.u32.totalorder %s4804_s24, %s5251_s3 }
   0x7   :  { %p4810_p2 = pnand %p4808_p1, %p4805_p0 }
   0x9   :  { %4813 = shalt.err (!%p4810_p2)
}
   0xa   :  { %s4814_s29 = scalar_lea.vmem %s34_s19, 128  ;;  %p4819_p4 = scmp.lt.s32.totalorder %s34_s19, %s34_s19 }
   0xb   :  { %p4815_p3 = scmp.ne.s32.totalorder %s34_s19, %s4814_s29  ;;  %p4820_p5 = scmp.lt.s32.totalorder %s4814_s29, %s4814_s29 }
   0xd   :  { %p4821_p6 = por %p4820_p5, %p4819_p4 }
   0xf   :  { %p4822_p7 = pnand %p4821_p6, %p4815_p3 }
  0x11   :  { %4825 = shalt.err (!%p4822_p7)
}
  0x12   :  { %36 = dma.hbm_to_vmem [thread:$0]  %s5251_s3, 128, %s34_s19, [#allocation6]  }
  0x13   :  { %s4826_s9 = scalar_lea.hbm %s5250_s2, 1024 }
  0x14   :  { %p4827_p8 = scmp.ne.s32.totalorder %s5250_s2, %s4826_s9  ;;  %p4830_p9 = scmp.lt.u32.totalorder %s4826_s9, %s5250_s2 }
  0x16   :  { %p4832_p10 = pnand %p4830_p9, %p4827_p8 }
  0x18   :  { %4835 = shalt.err (!%p4832_p10)
}
  0x19   :  { %s4836_s14 = scalar_lea.vmem %s24_s21, 1024  ;;  %p4841_p12 = scmp.lt.s32.totalorder %s24_s21, %s24_s21 }
  0x1a   :  { %p4837_p11 = scmp.ne.s32.totalorder %s24_s21, %s4836_s14  ;;  %p4842_p13 = scmp.lt.s32.totalorder %s4836_s14, %s4836_s14 }
  0x1c   :  { %p4843_p0 = por %p4842_p13, %p4841_p12 }
  0x1e   :  { %p4844_p1 = pnand %p4843_p0, %p4837_p11 }
  0x20   :  { %4847 = shalt.err (!%p4844_p1)
}
  0x21   :  { %26 = dma.hbm_to_vmem [thread:$0]  %s5250_s2, 1024, %s24_s21, [#allocation3]  }
  0x22   :  { %s4900_s16 = smov [#allocation7]   ;;  %s4848_s20 = scalar_lea.hbm %s5252_s4, 65536 }
  0x23   :  { %s42_s17 = sshll.u32 %s4900_s16, 4  ;;  %p4849_p2 = scmp.ne.s32.totalorder %s5252_s4, %s4848_s20  ;;  %s43_s17 = int_to_ptr.vmem [resolvable:$true] %s42_s17 }
  0x24   :  { %p4852_p3 = scmp.lt.u32.totalorder %s4848_s20, %s5252_s4 }
  0x26   :  { %p4854_p4 = pnand %p4852_p3, %p4849_p2 }
  0x28   :  { %4857 = shalt.err (!%p4854_p4)
}
  0x29   :  { %s4858_s26 = scalar_lea.vmem %s43_s17, 65536  ;;  %p4863_p6 = scmp.lt.s32.totalorder %s43_s17, %s43_s17 }
  0x2a   :  { %p4859_p5 = scmp.ne.s32.totalorder %s43_s17, %s4858_s26  ;;  %p4864_p7 = scmp.lt.s32.totalorder %s4858_s26, %s4858_s26 }
  0x2c   :  { %p4865_p8 = por %p4864_p7, %p4863_p6 }
  0x2e   :  { %p4866_p9 = pnand %p4865_p8, %p4859_p5 }
  0x30   :  { %4869 = shalt.err (!%p4866_p9)
}
  0x31   :  { %s4901_s2 = smov 512   ;;  %s4902_s21 = smov 32  }
  0x32   :  { %48 = dma.hbm_to_vmem [thread:$0]  %s5252_s4, 65536, %s43_s17, [#allocation6], %s4901_s2, %s4901_s2, %s4902_s21  }
  0x33   :  { %4892 = dma.done.wait [#allocation3], 1024  }
  0x34   :  { %4893 = vsyncadd [#allocation3], 4294966272 }
  0x35   :  { %4894 = dma.done.wait [#allocation6], 65664  }
  0x36   :  { %4895 = vsyncadd [#allocation6], 4294901632  ;;  %v4903_v0 = vmov 0   ;;  %v4904_v1 = vmov 2   ;;  %v58_v2 = vld [vmem:[%s5248_s0] sm:$0xff]  ;;  %v428_v3 = vld [vmem:[#allocation7] sm:$0xff]  ;;  %v74_v15 = vlaneseq }
  0x37   :  { %4766 = vset.pattern.permute.xlu0 %v4903_v0  ;;  %4768 = vset.pattern.permute.xlu1 %v4904_v1  ;;  %v432_v4 = vld [vmem:[#allocation7 + $0x20] sm:$0xff]  ;;  %v429_v5 = vld [vmem:[#allocation7 + $0x8] sm:$0xff]  ;;  %v4905_v18 = vmov 1   ;;  %v4906_v19 = vmov 3   ;;  %v4987_v38 = vld [vmem:[#allocation5] sm:$0xff] }
  0x38   :  { %71 = vperm.xlu0 %4766, %v58_v2   ;;  %216 = vperm.xlu1 %4768, %v58_v2   ;;  %v433_v6 = vld [vmem:[#allocation7 + $0x28] sm:$0xff]  ;;  %v4197_v7 = vcombine.high %v428_v3, %v432_v4  ;;  %v436_v9 = vld [vmem:[#allocation7 + $0x40] sm:$0xff]  ;;  %v4196_v12 = vcombine.low %v428_v3, %v432_v4  ;;  %v4978_v25 = vshrl.u32 %v74_v15, 7 }
  0x39   :  { %v4199_v8 = vcombine.high %v429_v5, %v433_v6  ;;  %v440_v10 = vld [vmem:[#allocation7 + $0x60] sm:$0xff]  ;;  %v437_v11 = vld [vmem:[#allocation7 + $0x48] sm:$0xff]  ;;  %v4198_v13 = vcombine.low %v429_v5, %v433_v6 }
  0x3a   :  { %v441_v14 = vld [vmem:[#allocation7 + $0x68] sm:$0xff]  ;;  %3500 = vmatprep.subr.bf16.mxu0 %v4197_v7  ;;  %v4205_v16 = vcombine.high %v436_v9, %v440_v10  ;;  %v444_v20 = vld [vmem:[#allocation7 + $0x80] sm:$0xff]  ;;  %v4204_v24 = vcombine.low %v436_v9, %v440_v10  ;;  %v4985_v35 = vsub.s32 2, %v4978_v25  ;;  %v4990_v39 = vsub.s32 4, %v4978_v25 }
  0x3b   :  { %3664 = vmatprep.subr.bf16.mxu1 %v4199_v8  ;;  %v4207_v17 = vcombine.high %v437_v11, %v441_v14  ;;  %v448_v21 = vld [vmem:[#allocation7 + $0xa0] sm:$0xff]  ;;  %v445_v22 = vld [vmem:[#allocation7 + $0x88] sm:$0xff]  ;;  %3501 = vmatpush1.bf16.msra.mxu0 %v4196_v12  ;;  %v4206_v27 = vcombine.low %v437_v11, %v441_v14  ;;  %v137_v40 = vsub.s32 5, %v4978_v25  ;;  %v141_v44 = vsub.s32 6, %v4978_v25 }
  0x3c   :  { %4767 = vset.pattern.permute.xlu0 %v4905_v18  ;;  %4769 = vset.pattern.permute.xlu1 %v4906_v19  ;;  %v449_v23 = vld [vmem:[#allocation7 + $0xa8] sm:$0xff]  ;;  %v4213_v28 = vcombine.high %v444_v20, %v448_v21  ;;  %v452_v30 = vld [vmem:[#allocation7 + $0xc0] sm:$0xff]  ;;  %v4212_v34 = vcombine.low %v444_v20, %v448_v21  ;;  %v145_v45 = vsub.s32 7, %v4978_v25 }
  0x3d   :  { %164 = vperm.xlu0 %4767, %v58_v2   ;;  %268 = vperm.xlu1 %4769, %v58_v2   ;;  %v59_v26 = vld [vmem:[%s5249_s1] sm:$0xff]  ;;  %v4215_v29 = vcombine.high %v445_v22, %v449_v23  ;;  %v456_v31 = vld [vmem:[#allocation7 + $0xe0] sm:$0xff]  ;;  %v4214_v36 = vcombine.low %v445_v22, %v449_v23  ;;  %v5001_v53 = vrot.slane %v4987_v38, %v137_v40  ;;  %s4907_s1 = smov [#allocation8]  }
  0x3e   :  { %3665 = vmatpush1.bf16.msra.mxu1 %v4198_v13  ;;  %3502 = vmatprep.subr.bf16.mxu0 %v4205_v16  ;;  %v453_v32 = vld [vmem:[#allocation7 + $0xc8] sm:$0xff]  ;;  %v4221_v37 = vcombine.high %v452_v30, %v456_v31  ;;  %v460_v42 = vld [vmem:[#allocation7 + $0x100] sm:$0xff]  ;;  %v4220_v48 = vcombine.low %v452_v30, %v456_v31  ;;  %v5004_v57 = vrot.slane %v4987_v38, %v141_v44  ;;  %s4178_s6 = sshll.u32 %s4907_s1, 4  ;;  %s4179_s6 = int_to_ptr.vmem [resolvable:$true] %s4178_s6 }
  0x3f   :  { %3666 = vmatprep.subr.bf16.mxu1 %v4207_v17  ;;  %v457_v33 = vld [vmem:[#allocation7 + $0xe8] sm:$0xff]  ;;  %3503 = vmatpush1.bf16.msra.mxu0 %v4204_v24  ;;  %v464_v43 = vld [vmem:[#allocation7 + $0x120] sm:$0xff]  ;;  %v5007_v58 = vrot.slane %v4987_v38, %v145_v45  ;;  %s4870_s7 = scalar_lea.vmem %s4179_s6, 1024  ;;  %p4875_p11 = scmp.lt.s32.totalorder %s4179_s6, %s4179_s6 }
  0x40   :  { %3504 = vmatprep.subr.bf16.mxu0 %v4213_v28  ;;  %v4223_v41 = vcombine.high %v453_v32, %v457_v33  ;;  %v461_v46 = vld [vmem:[#allocation7 + $0x108] sm:$0xff]  ;;  %v4222_v49 = vcombine.low %v453_v32, %v457_v33  ;;  %v4229_v51 = vcombine.high %v460_v42, %v464_v43  ;;  %v468_v55 = vld [vmem:[#allocation7 + $0x140] sm:$0xff]  ;;  %5261 = vst [vmem:[#allocation12_spill] sm:$0xff] %v5004_v57  ;;  %p4871_p10 = scmp.ne.s32.totalorder %s4179_s6, %s4870_s7  ;;  %p4876_p12 = scmp.lt.s32.totalorder %s4870_s7, %s4870_s7 }
  0x41   :  { %4770 = vset.pattern.permute.xlu1 %v4903_v0  ;;  %v465_v47 = vld [vmem:[#allocation7 + $0x128] sm:$0xff]  ;;  %4771 = vset.pattern.permute.xlu0 %v4903_v0  ;;  %v472_v56 = vld [vmem:[#allocation7 + $0x160] sm:$0xff]  ;;  %5262 = vst [vmem:[#allocation13_spill] sm:$0xff] %v5007_v58  ;;  %v4228_v61 = vcombine.low %v460_v42, %v464_v43 }
  0x42   :  { %321 = vperm.xlu1 %4770, %v59_v26   ;;  %3667 = vmatpush1.bf16.msra.mxu1 %v4206_v27  ;;  %v4231_v54 = vcombine.high %v461_v46, %v465_v47  ;;  %v469_v59 = vld [vmem:[#allocation7 + $0x148] sm:$0xff]  ;;  %v4230_v62 = vcombine.low %v461_v46, %v465_v47  ;;  %v4237_v63 = vcombine.high %v468_v55, %v472_v56  ;;  %v476_v1 = vld [vmem:[#allocation7 + $0x180] sm:$0xff]  ;;  %p4877_p13 = por %p4876_p12, %p4875_p11 }
  0x43   :  { %3668 = vmatprep.subr.bf16.mxu1 %v4215_v29  ;;  %3505 = vmatpush1.bf16.msra.mxu0 %v4212_v34  ;;  %v473_v60 = vld [vmem:[#allocation7 + $0x168] sm:$0xff]  ;;  %v480_v2 = vld [vmem:[#allocation7 + $0x1a0] sm:$0xff]  ;;  %v4236_v5 = vcombine.low %v468_v55, %v472_v56 }
  0x44   :  { %3506 = vmatprep.subr.bf16.mxu0 %v4221_v37  ;;  %v4239_v0 = vcombine.high %v469_v59, %v473_v60  ;;  %v477_v3 = vld [vmem:[#allocation7 + $0x188] sm:$0xff]  ;;  %v4238_v6 = vcombine.low %v469_v59, %v473_v60  ;;  %v4245_v7 = vcombine.high %v476_v1, %v480_v2  ;;  %v484_v9 = vld [vmem:[#allocation7 + $0x1c0] sm:$0xff]  ;;  %v4244_v13 = vcombine.low %v476_v1, %v480_v2  ;;  %p4878_p0 = pnand %p4877_p13, %p4871_p10 }
  0x45   :  { %v481_v4 = vld [vmem:[#allocation7 + $0x1a8] sm:$0xff]  ;;  %v488_v10 = vld [vmem:[#allocation7 + $0x1e0] sm:$0xff] }
  0x46   :  { %3669 = vmatpush1.bf16.msra.mxu1 %v4214_v36  ;;  %v4247_v8 = vcombine.high %v477_v3, %v481_v4  ;;  %v485_v11 = vld [vmem:[#allocation7 + $0x1c8] sm:$0xff]  ;;  %v4246_v14 = vcombine.low %v477_v3, %v481_v4  ;;  %v4253_v15 = vcombine.high %v484_v9, %v488_v10  ;;  %v492_v17 = vld [vmem:[#allocation7 + $0x200] sm:$0xff]  ;;  %v4252_v21 = vcombine.low %v484_v9, %v488_v10 }
  0x47   :  { %3670 = vmatprep.subr.bf16.mxu1 %v4223_v41  ;;  %3507 = vmatpush1.bf16.msra.mxu0 %v4220_v48  ;;  %v489_v12 = vld [vmem:[#allocation7 + $0x1e8] sm:$0xff]  ;;  %v496_v18 = vld [vmem:[#allocation7 + $0x220] sm:$0xff] }
  0x48   :  { %3508 = vmatprep.subr.bf16.mxu0 %v4229_v51  ;;  %v4255_v16 = vcombine.high %v485_v11, %v489_v12  ;;  %v493_v19 = vld [vmem:[#allocation7 + $0x208] sm:$0xff]  ;;  %v4254_v22 = vcombine.low %v485_v11, %v489_v12  ;;  %v4261_v23 = vcombine.high %v492_v17, %v496_v18  ;;  %v500_v26 = vld [vmem:[#allocation7 + $0x240] sm:$0xff]  ;;  %v4260_v30 = vcombine.low %v492_v17, %v496_v18 }
  0x49   :  { %v497_v20 = vld [vmem:[#allocation7 + $0x228] sm:$0xff]  ;;  %v504_v27 = vld [vmem:[#allocation7 + $0x260] sm:$0xff] }
  0x4a   :  { %3671 = vmatpush1.bf16.msra.mxu1 %v4222_v49  ;;  %v4263_v24 = vcombine.high %v493_v19, %v497_v20  ;;  %v501_v28 = vld [vmem:[#allocation7 + $0x248] sm:$0xff]  ;;  %v4262_v31 = vcombine.low %v493_v19, %v497_v20  ;;  %v4269_v32 = vcombine.high %v500_v26, %v504_v27  ;;  %v508_v34 = vld [vmem:[#allocation7 + $0x280] sm:$0xff]  ;;  %v4268_v41 = vcombine.low %v500_v26, %v504_v27 }
  0x4b   :  { %3672 = vmatprep.subr.bf16.mxu1 %v4231_v54  ;;  %3509 = vmatpush1.bf16.msra.mxu0 %v4228_v61  ;;  %v505_v29 = vld [vmem:[#allocation7 + $0x268] sm:$0xff]  ;;  %v512_v36 = vld [vmem:[#allocation7 + $0x2a0] sm:$0xff] }
  0x4c   :  { %3510 = vmatprep.subr.bf16.mxu0 %v4237_v63  ;;  %v4271_v33 = vcombine.high %v501_v28, %v505_v29  ;;  %v509_v37 = vld [vmem:[#allocation7 + $0x288] sm:$0xff]  ;;  %v4270_v42 = vcombine.low %v501_v28, %v505_v29  ;;  %v4277_v43 = vcombine.high %v508_v34, %v512_v36  ;;  %v516_v45 = vld [vmem:[#allocation7 + $0x2c0] sm:$0xff]  ;;  %v4276_v49 = vcombine.low %v508_v34, %v512_v36 }
  0x4d   :  { %v513_v40 = vld [vmem:[#allocation7 + $0x2a8] sm:$0xff]  ;;  %v520_v46 = vld [vmem:[#allocation7 + $0x2e0] sm:$0xff] }
  0x4e   :  { %3673 = vmatpush1.bf16.msra.mxu1 %v4230_v62  ;;  %v4279_v44 = vcombine.high %v509_v37, %v513_v40  ;;  %v517_v47 = vld [vmem:[#allocation7 + $0x2c8] sm:$0xff]  ;;  %v4278_v51 = vcombine.low %v509_v37, %v513_v40  ;;  %v4285_v54 = vcombine.high %v516_v45, %v520_v46  ;;  %v524_v56 = vld [vmem:[#allocation7 + $0x300] sm:$0xff]  ;;  %v4284_v62 = vcombine.low %v516_v45, %v520_v46  ;;  %v5025_v40 = vld [vmem:[#allocation2] sm:$0x1f] }
  0x4f   :  { %3674 = vmatprep.subr.bf16.mxu1 %v4239_v0  ;;  %3511 = vmatpush1.bf16.msra.mxu0 %v4236_v5  ;;  %v521_v48 = vld [vmem:[#allocation7 + $0x2e8] sm:$0xff]  ;;  %v528_v59 = vld [vmem:[#allocation7 + $0x320] sm:$0xff]  ;;  %v5036_v45 = vld [vmem:[#allocation2 + $0x20] sm:$0x1f] }
  0x50   :  { %3512 = vmatprep.subr.bf16.mxu0 %v4245_v7  ;;  %v4287_v55 = vcombine.high %v517_v47, %v521_v48  ;;  %v525_v60 = vld [vmem:[#allocation7 + $0x308] sm:$0xff]  ;;  %v5009_v63 = vld [vmem:[#allocation7 + $0x400] sm:$0xff]  ;;  %v4286_v2 = vcombine.low %v517_v47, %v521_v48  ;;  %v4293_v3 = vcombine.high %v524_v56, %v528_v59  ;;  %v4292_v12 = vcombine.low %v524_v56, %v528_v59  ;;  %v5042_v48 = vld [vmem:[#allocation2 + $0x38] sm:$0x1f] }
  0x51   :  { %v529_v61 = vld [vmem:[#allocation7 + $0x328] sm:$0xff]  ;;  %5263 = vst [vmem:[#allocation14_spill] sm:$0xff] %v5009_v63  ;;  %v5011_v0 = vld [vmem:[#allocation7 + $0x420] sm:$0xff]  ;;  %5267 = vst [vmem:[#allocation18_spill] sm:$0xff] %v5036_v45 }
  0x52   :  { %3675 = vmatpush1.bf16.msra.mxu1 %v4238_v6  ;;  %5264 = vst [vmem:[#allocation15_spill] sm:$0xff] %v5011_v0  ;;  %v5013_v1 = vld [vmem:[#allocation7 + $0x408] sm:$0xff]  ;;  %v4295_v6 = vcombine.high %v525_v60, %v529_v61  ;;  %v532_v7 = vld [vmem:[#allocation7 + $0x340] sm:$0xff]  ;;  %v4325_v36 = vcombine.high %v5009_v63, %v5011_v0  ;;  %5269 = vst [vmem:[#allocation20_spill] sm:$0xff] %v5042_v48 }
  0x53   :  { %3676 = vmatprep.subr.bf16.mxu1 %v4247_v8  ;;  %3513 = vmatpush1.bf16.msra.mxu0 %v4244_v13  ;;  %5265 = vst [vmem:[#allocation16_spill] sm:$0xff] %v5013_v1  ;;  %v5017_v5 = vld [vmem:[#allocation7 + $0x428] sm:$0xff]  ;;  %v536_v8 = vld [vmem:[#allocation7 + $0x360] sm:$0xff]  ;;  %v4294_v13 = vcombine.low %v525_v60, %v529_v61 }
  0x54   :  { %3514 = vmatprep.subr.bf16.mxu0 %v4253_v15  ;;  %5266 = vst [vmem:[#allocation17_spill] sm:$0xff] %v5017_v5  ;;  %v533_v10 = vld [vmem:[#allocation7 + $0x348] sm:$0xff]  ;;  %v544_v17 = vld [vmem:[#allocation7 + $0x3a0] sm:$0xff]  ;;  %v4300_v20 = vcombine.low %v532_v7, %v536_v8  ;;  %v4327_v37 = vcombine.high %v5013_v1, %v5017_v5 }
  0x55   :  { %v537_v11 = vld [vmem:[#allocation7 + $0x368] sm:$0xff]  ;;  %v552_v26 = vld [vmem:[#allocation7 + $0x3e0] sm:$0xff] }
  0x56   :  { %3677 = vmatpush1.bf16.msra.mxu1 %v4246_v14  ;;  %v4301_v14 = vcombine.high %v532_v7, %v536_v8  ;;  %v4303_v15 = vcombine.high %v533_v10, %v537_v11  ;;  %v541_v18 = vld [vmem:[#allocation7 + $0x388] sm:$0xff]  ;;  %v5038_v46 = vld [vmem:[#allocation2 + $0x28] sm:$0x1f]  ;;  %v238_v8 = vrot.slane %v5036_v45, %v4985_v35 }
  0x57   :  { %3678 = vmatprep.subr.bf16.mxu1 %v4255_v16  ;;  %3515 = vmatpush1.bf16.msra.mxu0 %v4252_v21  ;;  %v540_v16 = vld [vmem:[#allocation7 + $0x380] sm:$0xff]  ;;  %v545_v19 = vld [vmem:[#allocation7 + $0x3a8] sm:$0xff]  ;;  %v4302_v21 = vcombine.low %v533_v10, %v537_v11  ;;  %v242_v10 = vrot.slane %v5038_v46, %v4985_v35 }
  0x58   :  { %3516 = vmatprep.subr.bf16.mxu0 %v4261_v23  ;;  %v4311_v23 = vcombine.high %v541_v18, %v545_v19  ;;  %v549_v27 = vld [vmem:[#allocation7 + $0x3c8] sm:$0xff]  ;;  %v4308_v29 = vcombine.low %v540_v16, %v544_v17 }
  0x59   :  { %v553_v28 = vld [vmem:[#allocation7 + $0x3e8] sm:$0xff] }
  0x5a   :  { %3679 = vmatpush1.bf16.msra.mxu1 %v4254_v22  ;;  %v4309_v22 = vcombine.high %v540_v16, %v544_v17  ;;  %v4318_v34 = vcombine.low %v549_v27, %v553_v28  ;;  %v5040_v47 = vld [vmem:[#allocation2 + $0x30] sm:$0x1f] }
  0x5b   :  { %3680 = vmatprep.subr.bf16.mxu1 %v4263_v24  ;;  %3517 = vmatpush1.bf16.msra.mxu0 %v4260_v30  ;;  %v548_v24 = vld [vmem:[#allocation7 + $0x3c0] sm:$0xff]  ;;  %v4310_v30 = vcombine.low %v541_v18, %v545_v19  ;;  %5268 = vst [vmem:[#allocation19_spill] sm:$0xff] %v5040_v47  ;;  %v246_v11 = vrot.slane %v5040_v47, %v4985_v35 }
  0x5c   :  { %3518 = vmatprep.subr.bf16.mxu0 %v4269_v32  ;;  %v4319_v32 = vcombine.high %v549_v27, %v553_v28 }
  0x5e   :  { %3681 = vmatpush1.bf16.msra.mxu1 %v4262_v31  ;;  %v4317_v31 = vcombine.high %v548_v24, %v552_v26 }
  0x5f   :  { %3682 = vmatprep.subr.bf16.mxu1 %v4271_v33  ;;  %3519 = vmatpush1.bf16.msra.mxu0 %v4268_v41  ;;  %v4316_v33 = vcombine.low %v548_v24, %v552_v26  ;;  %v5028_v41 = vsub.s32 0, %v4978_v25  ;;  %v327_v24 = vrot.slane %v5025_v40, %v4990_v39 }
  0x60   :  { %3520 = vmatprep.subr.bf16.mxu0 %v4277_v43  ;;  %v5032_v43 = vld [vmem:[#allocation2 + $0x10] sm:$0x1f] }
  0x61   :  { %v85_v56 = vrot.slane %v5032_v43, %v5028_v41  ;;  %v93_v60 = vrot.slane %v5036_v45, %v5028_v41  ;;  %v97_v61 = vrot.slane %v5038_v46, %v5028_v41  ;;  %v335_v27 = vrot.slane %v5032_v43, %v4990_v39 }
  0x62   :  { %3683 = vmatpush1.bf16.msra.mxu1 %v4270_v42  ;;  %v5030_v42 = vld [vmem:[#allocation2 + $0x8] sm:$0x1f] }
  0x63   :  { %3684 = vmatprep.subr.bf16.mxu1 %v4279_v44  ;;  %3521 = vmatpush1.bf16.msra.mxu0 %v4276_v49  ;;  %v5034_v44 = vld [vmem:[#allocation2 + $0x18] sm:$0x1f]  ;;  %v5045_v49 = vsub.s32 1, %v4978_v25  ;;  %v331_v26 = vrot.slane %v5030_v42, %v4990_v39 }
  0x64   :  { %3522 = vmatprep.subr.bf16.mxu0 %v4285_v54  ;;  %v77_v54 = vrot.slane %v5025_v40, %v5028_v41  ;;  %v89_v59 = vrot.slane %v5034_v44, %v5028_v41  ;;  %v234_v7 = vrot.slane %v5034_v44, %v4985_v35  ;;  %v339_v28 = vrot.slane %v5034_v44, %v4990_v39 }
  0x65   :  { %v170_v16 = vrot.slane %v5025_v40, %v5045_v49  ;;  %v174_v17 = vrot.slane %v5030_v42, %v5045_v49  ;;  %v178_v18 = vrot.slane %v5032_v43, %v5045_v49  ;;  %v182_v19 = vrot.slane %v5034_v44, %v5045_v49 }
  0x66   :  { %3685 = vmatpush1.bf16.msra.mxu1 %v4278_v51  ;;  %v5048_v51 = vsub.s32 3, %v4978_v25  ;;  %v101_v25 = vrot.slane %v5040_v47, %v5028_v41 }
  0x67   :  { %3686 = vmatprep.subr.bf16.mxu1 %v4287_v55  ;;  %3523 = vmatpush1.bf16.msra.mxu0 %v4284_v62  ;;  %v81_v55 = vrot.slane %v5030_v42, %v5028_v41  ;;  %v222_v62 = vrot.slane %v5025_v40, %v4985_v35 }
  0x68   :  { %3524 = vmatprep.subr.bf16.mxu0 %v4293_v3  ;;  %v226_v3 = vrot.slane %v5030_v42, %v4985_v35 }
  0x6a   :  { %3687 = vmatpush1.bf16.msra.mxu1 %v4286_v2  ;;  %v105_v2 = vrot.slane %v5042_v48, %v5028_v41 }
  0x6b   :  { %3688 = vmatprep.subr.bf16.mxu1 %v4295_v6  ;;  %3525 = vmatpush1.bf16.msra.mxu0 %v4292_v12  ;;  %v230_v6 = vrot.slane %v5032_v43, %v4985_v35  ;;  %v250_v12 = vrot.slane %v5042_v48, %v4985_v35 }
  0x6c   :  { %3526 = vmatprep.subr.bf16.mxu0 %v4301_v14  ;;  %v122_v14 = vrot.slane %v4987_v38, %v5045_v49 }
  0x6e   :  { %3689 = vmatpush1.bf16.msra.mxu1 %v4294_v13  ;;  %v118_v13 = vrot.slane %v4987_v38, %v5028_v41  ;;  %v286_v41 = vrot.slane %v5034_v44, %v5048_v51 }
  0x6f   :  { %3690 = vmatprep.subr.bf16.mxu1 %v4303_v15  ;;  %3527 = vmatpush1.bf16.msra.mxu0 %v4300_v20  ;;  %v130_v15 = vrot.slane %v4987_v38, %v5048_v51  ;;  %v186_v20 = vrot.slane %v5036_v45, %v5045_v49 }
  0x70   :  { %3528 = vmatprep.subr.bf16.mxu0 %v4309_v22  ;;  %v194_v22 = vrot.slane %v5040_v47, %v5045_v49 }
  0x72   :  { %3691 = vmatpush1.bf16.msra.mxu1 %v4302_v21  ;;  %v190_v21 = vrot.slane %v5038_v46, %v5045_v49 }
  0x73   :  { %3692 = vmatprep.subr.bf16.mxu1 %v4311_v23  ;;  %3529 = vmatpush1.bf16.msra.mxu0 %v4308_v29  ;;  %v198_v23 = vrot.slane %v5042_v48, %v5045_v49  ;;  %v343_v29 = vrot.slane %v5036_v45, %v4990_v39  ;;  %v282_v49 = vrot.slane %v5032_v43, %v5048_v51 }
  0x74   :  { %3530 = vmatprep.subr.bf16.mxu0 %v4317_v31  ;;  %v351_v31 = vrot.slane %v5040_v47, %v4990_v39 }
  0x76   :  { %3693 = vmatpush1.bf16.msra.mxu1 %v4310_v30  ;;  %v347_v30 = vrot.slane %v5038_v46, %v4990_v39 }
  0x77   :  { %3694 = vmatprep.subr.bf16.mxu1 %v4319_v32  ;;  %3531 = vmatpush1.bf16.msra.mxu0 %v4316_v33  ;;  %v355_v32 = vrot.slane %v5042_v48, %v4990_v39  ;;  %v278_v33 = vrot.slane %v5030_v42, %v5048_v51 }
  0x78   :  { %3541 = vmatprep.subr.bf16.mxu0 %v4325_v36 }
  0x7a   :  { %3695 = vmatpush1.bf16.msra.mxu1 %v4318_v34 }
  0x7b   :  { %3705 = vmatprep.subr.bf16.mxu1 %v4327_v37  ;;  %v274_v37 = vrot.slane %v5025_v40, %v5048_v51 }
  0xb7   :  { %v72_v34 = vpop.permute.xlu0 %71  ;;  %v217_v36 = vpop.permute.xlu1 %216 }
  0xb8   :  { %v106_v4 = vmul.f32 %v77_v54, %v72_v34  ;;  %v107_v52 = vmul.f32 %v81_v55, %v72_v34  ;;  %v108_v50 = vmul.f32 %v85_v56, %v72_v34  ;;  %v109_v5 = vmul.f32 %v89_v59, %v72_v34 }
  0xb9   :  { %v110_v1 = vmul.f32 %v93_v60, %v72_v34  ;;  %v111_v42 = vmul.f32 %v97_v61, %v72_v34  ;;  %v112_v0 = vmul.f32 %v101_v25, %v72_v34  ;;  %v113_v63 = vmul.f32 %v105_v2, %v72_v34 }
  0xba   :  { %v251_v47 = vmul.f32 %v222_v62, %v217_v36  ;;  %v252_v48 = vmul.f32 %v226_v3, %v217_v36  ;;  %v253_v40 = vmul.f32 %v230_v6, %v217_v36  ;;  %v254_v45 = vmul.f32 %v234_v7, %v217_v36  ;;  %v5272_v3 = vld [vmem:[#allocation12_spill] sm:$0xff]  ;;  %v5273_v7 = vld [vmem:[#allocation13_spill] sm:$0xff] }
  0xbb   :  { %v5130_v58 = vmul.f32 %v238_v8, %v217_v36  ;;  %v256_v44 = vmul.f32 %v242_v10, %v217_v36  ;;  %v5132_v57 = vmul.f32 %v246_v11, %v217_v36  ;;  %v5134_v43 = vmul.f32 %v250_v12, %v217_v36 }
  0xbc   :  { %v155_v9 = vadd.f32 %v118_v13, %v106_v4  ;;  %v156_v54 = vadd.f32 %v122_v14, %v107_v52  ;;  %v5270_v55 = vrot.slane %v4987_v38, %v4985_v35  ;;  %v158_v59 = vadd.f32 %v130_v15, %v109_v5  ;;  %v165_v60 = vpop.permute.xlu0 %164  ;;  %v5139_v61 = vpop.permute.xlu1 %268 }
  0xbd   :  { %v5271_v25 = vrot.slane %v4987_v38, %v4990_v39  ;;  %v160_v2 = vadd.f32 %v5001_v53, %v111_v42  ;;  %v161_v6 = vadd.f32 %v5272_v3, %v112_v0  ;;  %v162_v8 = vadd.f32 %v5273_v7, %v113_v63 }
  0xbe   :  { %v157_v56 = vadd.f32 %v5270_v55, %v108_v50  ;;  %v199_v4 = vmul.f32 %v170_v16, %v165_v60  ;;  %v200_v52 = vmul.f32 %v174_v17, %v165_v60  ;;  %v201_v10 = vmul.f32 %v178_v18, %v165_v60 }
  0xbf   :  { %v159_v62 = vadd.f32 %v5271_v25, %v110_v1  ;;  %v202_v11 = vmul.f32 %v182_v19, %v165_v60  ;;  %v203_v35 = vmul.f32 %v186_v20, %v165_v60  ;;  %v204_v50 = vmul.f32 %v190_v21, %v165_v60 }
  0xc0   :  { %v205_v5 = vmul.f32 %v194_v22, %v165_v60  ;;  %v206_v12 = vmul.f32 %v198_v23, %v165_v60  ;;  %v207_v13 = vadd.f32 %v199_v4, %v155_v9  ;;  %v208_v14 = vadd.f32 %v200_v52, %v156_v54 }
  0xc1   :  { %v209_v15 = vadd.f32 %v201_v10, %v157_v56  ;;  %v210_v34 = vadd.f32 %v202_v11, %v158_v59  ;;  %v211_v38 = vadd.f32 %v203_v35, %v159_v62  ;;  %v212_v39 = vadd.f32 %v204_v50, %v160_v2  ;;  %v322_v36 = vpop.permute.xlu1 %321  ;;  %v5277_v62 = vld [vmem:[#allocation19_spill] sm:$0xff] }
  0xc2   :  { %v213_v1 = vadd.f32 %v205_v5, %v161_v6  ;;  %v214_v53 = vadd.f32 %v206_v12, %v162_v8  ;;  %v356_v0 = vmul.f32 %v327_v24, %v322_v36  ;;  %v357_v42 = vmul.f32 %v331_v26, %v322_v36 }
  0xc3   :  { %v358_v63 = vmul.f32 %v335_v27, %v322_v36  ;;  %v359_v16 = vmul.f32 %v339_v28, %v322_v36  ;;  %v360_v17 = vmul.f32 %v343_v29, %v322_v36  ;;  %v361_v18 = vmul.f32 %v347_v30, %v322_v36 }
  0xc4   :  { %v362_v19 = vmul.f32 %v351_v31, %v322_v36  ;;  %v363_v20 = vmul.f32 %v355_v32, %v322_v36  ;;  %v260_v21 = vadd.f32 %v252_v48, %v208_v14  ;;  %v304_v22 = vmul.f32 %v278_v33, %v5139_v61 }
  0xc5   :  { %v259_v9 = vadd.f32 %v251_v47, %v207_v13  ;;  %v303_v23 = vmul.f32 %v274_v37, %v5139_v61  ;;  %v262_v54 = vadd.f32 %v254_v45, %v210_v34  ;;  %v306_v55 = vmul.f32 %v286_v41, %v5139_v61 }
  0xc6   :  { %v261_v56 = vadd.f32 %v253_v40, %v209_v15  ;;  %v305_v59 = vmul.f32 %v282_v49, %v5139_v61  ;;  %v312_v24 = vadd.f32 %v304_v22, %v260_v21  ;;  %v264_v27 = vadd.f32 %v256_v44, %v212_v39  ;;  %v5275_v44 = vld [vmem:[#allocation18_spill] sm:$0xff]  ;;  %v569_v39 = vld [vmem:[#allocation7 + $0x468] sm:$0xff]  ;;  %v5279_v22 = vld [vmem:[#allocation15_spill] sm:$0xff] }
  0xc7   :  { %v311_v26 = vadd.f32 %v303_v23, %v259_v9  ;;  %v5274_v28 = vrot.slane %v5038_v46, %v5048_v51  ;;  %v314_v48 = vadd.f32 %v306_v55, %v262_v54  ;;  %v290_v60 = vrot.slane %v5275_v44, %v5048_v51  ;;  %v5276_v46 = vld [vmem:[#allocation20_spill] sm:$0xff]  ;;  %v5278_v21 = vld [vmem:[#allocation14_spill] sm:$0xff]  ;;  %v5282_v54 = vld [vmem:[#allocation17_spill] sm:$0xff] }
  0xc8   :  { %v313_v30 = vadd.f32 %v305_v59, %v261_v56  ;;  %v365_v31 = vadd.f32 %v357_v42, %v312_v24  ;;  %v302_v25 = vrot.slane %v5276_v46, %v5048_v51  ;;  %v298_v2 = vrot.slane %v5277_v62, %v5048_v51  ;;  %v572_v42 = vld [vmem:[#allocation7 + $0x480] sm:$0xff] }
  0xc9   :  { %v308_v29 = vmul.f32 %v5274_v28, %v5139_v61  ;;  %v364_v47 = vadd.f32 %v356_v0, %v311_v26  ;;  %v367_v33 = vadd.f32 %v359_v16, %v314_v48  ;;  %v263_v3 = vadd.f32 %v5130_v58, %v211_v38  ;;  %v568_v38 = vld [vmem:[#allocation7 + $0x460] sm:$0xff]  ;;  %v585_v48 = vld [vmem:[#allocation7 + $0x4e8] sm:$0xff] }
  0xca   :  { %v5155_v45 = vadd.f32 %v358_v63, %v313_v30  ;;  %v4189_v37 = vmul.f32 -1.442695, %v365_v31  ;;  %v307_v6 = vmul.f32 %v290_v60, %v5139_v61  ;;  %v266_v7 = vadd.f32 %v5134_v43, %v214_v53  ;;  %v5281_v23 = vld [vmem:[#allocation16_spill] sm:$0xff] }
  0xcb   :  { %v316_v32 = vadd.f32 %v308_v29, %v264_v27  ;;  %v4188_v41 = vmul.f32 -1.442695, %v364_v47  ;;  %v4191_v49 = vmul.f32 -1.442695, %v367_v33  ;;  %v310_v8 = vmul.f32 %v302_v25, %v5139_v61  ;;  %v580_v27 = vld [vmem:[#allocation7 + $0x4c0] sm:$0xff]  ;;  %v581_v29 = vld [vmem:[#allocation7 + $0x4c8] sm:$0xff] }
  0xcc   :  { %4772 = vpow2.f32 %v4189_v37  ;;  %v315_v4 = vadd.f32 %v307_v6, %v263_v3  ;;  %v265_v52 = vadd.f32 %v5132_v57, %v213_v1  ;;  %v309_v11 = vmul.f32 %v298_v2, %v5139_v61  ;;  %v564_v57 = vld [vmem:[#allocation7 + $0x440] sm:$0xff]  ;;  %v565_v61 = vld [vmem:[#allocation7 + $0x448] sm:$0xff] }
  0xcd   :  { %v5157_v40 = vadd.f32 %v361_v18, %v316_v32  ;;  %4774 = vpow2.f32 %v4188_v41  ;;  %v318_v10 = vadd.f32 %v310_v8, %v266_v7  ;;  %v4333_v63 = vcombine.high %v564_v57, %v568_v38  ;;  %v573_v18 = vld [vmem:[#allocation7 + $0x488] sm:$0xff]  ;;  %v584_v28 = vld [vmem:[#allocation7 + $0x4e0] sm:$0xff] }
  0xce   :  { %4776 = vpow2.f32 %v4191_v49  ;;  %v5171_v35 = vadd.f32 %v360_v17, %v315_v4  ;;  %v317_v51 = vadd.f32 %v309_v11, %v265_v52  ;;  %v4335_v16 = vcombine.high %v565_v61, %v569_v39  ;;  %v576_v17 = vld [vmem:[#allocation7 + $0x4a0] sm:$0xff]  ;;  %v589_v41 = vld [vmem:[#allocation7 + $0x508] sm:$0xff] }
  0xcf   :  { %v5173_v5 = vadd.f32 %v363_v20, %v318_v10  ;;  %v5280_v9 = vcombine.low %v5278_v21, %v5279_v22  ;;  %v5283_v55 = vcombine.low %v5281_v23, %v5282_v54  ;;  %v4332_v56 = vcombine.low %v564_v57, %v568_v38  ;;  %v588_v33 = vld [vmem:[#allocation7 + $0x500] sm:$0xff]  ;;  %v593_v49 = vld [vmem:[#allocation7 + $0x528] sm:$0xff] }
  0xd0   :  { %v5175_v15 = vadd.f32 %v362_v19, %v317_v51  ;;  %v577_v19 = vld [vmem:[#allocation7 + $0x4a8] sm:$0xff]  ;;  %v4334_v59 = vcombine.low %v565_v61, %v569_v39  ;;  %v4341_v24 = vcombine.high %v572_v42, %v576_v17  ;;  %v4340_v30 = vcombine.low %v572_v42, %v576_v17  ;;  %v592_v37 = vld [vmem:[#allocation7 + $0x520] sm:$0xff] }
  0xd1   :  { %v4343_v26 = vcombine.high %v573_v18, %v577_v19  ;;  %v4342_v31 = vcombine.low %v573_v18, %v577_v19  ;;  %v4349_v47 = vcombine.high %v580_v27, %v584_v28  ;;  %v4351_v32 = vcombine.high %v581_v29, %v585_v48  ;;  %v596_v62 = vld [vmem:[#allocation7 + $0x540] sm:$0xff]  ;;  %v597_v3 = vld [vmem:[#allocation7 + $0x548] sm:$0xff] }
  0xd2   :  { %v4348_v44 = vcombine.low %v580_v27, %v584_v28  ;;  %v4350_v60 = vcombine.low %v581_v29, %v585_v48  ;;  %v4357_v46 = vcombine.high %v588_v33, %v592_v37  ;;  %v4359_v25 = vcombine.high %v589_v41, %v593_v49  ;;  %v600_v2 = vld [vmem:[#allocation7 + $0x560] sm:$0xff]  ;;  %v601_v6 = vld [vmem:[#allocation7 + $0x568] sm:$0xff] }
  0xd3   :  { %v4356_v7 = vcombine.low %v588_v33, %v592_v37  ;;  %v4358_v8 = vcombine.low %v589_v41, %v593_v49  ;;  %v4365_v4 = vcombine.high %v596_v62, %v600_v2  ;;  %v4367_v52 = vcombine.high %v597_v3, %v601_v6  ;;  %v604_v10 = vld [vmem:[#allocation7 + $0x580] sm:$0xff]  ;;  %v609_v51 = vld [vmem:[#allocation7 + $0x5a8] sm:$0xff] }
  0xd4   :  { %v608_v11 = vld [vmem:[#allocation7 + $0x5a0] sm:$0xff]  ;;  %v617_v38 = vld [vmem:[#allocation7 + $0x5e8] sm:$0xff] }
  0xd5   :  { %v616_v57 = vld [vmem:[#allocation7 + $0x5e0] sm:$0xff]  ;;  %v4372_v61 = vcombine.low %v604_v10, %v608_v11  ;;  %v625_v17 = vld [vmem:[#allocation7 + $0x628] sm:$0xff] }
  0xd6   :  { %v4773_v50 = vpop.eup %4772  ;;  %v620_v42 = vld [vmem:[#allocation7 + $0x600] sm:$0xff]  ;;  %v629_v54 = vld [vmem:[#allocation7 + $0x648] sm:$0xff] }
  0xd7   :  { %v4775_v12 = vpop.eup %4774  ;;  %v397_v58 = vadd.f32 1.0, %v4773_v50  ;;  %v605_v50 = vld [vmem:[#allocation7 + $0x588] sm:$0xff]  ;;  %v632_v23 = vld [vmem:[#allocation7 + $0x660] sm:$0xff] }
  0xd8   :  { %v4777_v13 = vpop.eup %4776  ;;  %v396_v14 = vadd.f32 1.0, %v4775_v12  ;;  %v4364_v12 = vcombine.low %v596_v62, %v600_v2  ;;  %v4374_v39 = vcombine.low %v605_v50, %v609_v51  ;;  %v636_v29 = vld [vmem:[#allocation7 + $0x680] sm:$0xff]  ;;  %v645_v41 = vld [vmem:[#allocation7 + $0x6c8] sm:$0xff] }
  0xd9   :  { %4778 = vrcp.f32 %v397_v58  ;;  %v399_v43 = vadd.f32 1.0, %v4777_v13  ;;  %v4366_v58 = vcombine.low %v597_v3, %v601_v6  ;;  %v4373_v13 = vcombine.high %v604_v10, %v608_v11  ;;  %v640_v48 = vld [vmem:[#allocation7 + $0x6a0] sm:$0xff]  ;;  %v649_v49 = vld [vmem:[#allocation7 + $0x6e8] sm:$0xff] }
  0xda   :  { %4780 = vrcp.f32 %v396_v14  ;;  %v4375_v14 = vcombine.high %v605_v50, %v609_v51  ;;  %v644_v37 = vld [vmem:[#allocation7 + $0x6c0] sm:$0xff]  ;;  %v653_v3 = vld [vmem:[#allocation7 + $0x708] sm:$0xff] }
  0xdb   :  { %4782 = vrcp.f32 %v399_v43  ;;  %v612_v43 = vld [vmem:[#allocation7 + $0x5c0] sm:$0xff]  ;;  %v657_v6 = vld [vmem:[#allocation7 + $0x728] sm:$0xff] }
  0xdc   :  { %v4380_v18 = vcombine.low %v612_v43, %v616_v57  ;;  %v652_v62 = vld [vmem:[#allocation7 + $0x700] sm:$0xff]  ;;  %v4423_v10 = vcombine.high %v653_v3, %v657_v6 }
  0xdd   :  { %v656_v2 = vld [vmem:[#allocation7 + $0x720] sm:$0xff] }
  0xde   :  { %v660_v11 = vld [vmem:[#allocation7 + $0x740] sm:$0xff] }
  0xdf   :  { %v664_v51 = vld [vmem:[#allocation7 + $0x760] sm:$0xff] }
  0xe3   :  { %v4779_v34 = vpop.eup %4778 }
  0xe4   :  { %v4781_v1 = vpop.eup %4780  ;;  %v5177_v53 = vpack.c.bf16 %v4779_v34, %v4779_v34  ;;  %v613_v34 = vld [vmem:[#allocation7 + $0x5c8] sm:$0xff] }
  0xe5   :  { %v4783_v36 = vpop.eup %4782  ;;  %v5179_v0 = vpack.c.bf16 %v4781_v1, %v4781_v1  ;;  %v4381_v1 = vcombine.high %v612_v43, %v616_v57  ;;  %v4382_v19 = vcombine.low %v613_v34, %v617_v38  ;;  %v4429_v57 = vcombine.high %v660_v11, %v664_v51 }
  0xe6   :  { %3532 = vmatprep.mubr.bf16.mxu0 %v5177_v53  ;;  %3696 = vmatprep.mubr.bf16.mxu1 %v5177_v53  ;;  %v5185_v20 = vpack.c.bf16 %v4783_v36, %v4783_v36  ;;  %v4383_v36 = vcombine.high %v613_v34, %v617_v38  ;;  %v668_v38 = vld [vmem:[#allocation7 + $0x780] sm:$0xff] }
  0xe7   :  { %3533 = vmatmul.mubr.bf16.vlgmr.msra.gmra.mrb[0].mxu0 %v5179_v0  ;;  %3697 = vmatmul.mubr.bf16.vlgmr.msra.gmra.mrb[0].mxu1 %v5179_v0 }
  0xe8   :  { %3542 = vmatpush1.bf16.msra.mxu0 %v5280_v9  ;;  %3706 = vmatpush1.bf16.msra.mxu1 %v5283_v55  ;;  %v628_v9 = vld [vmem:[#allocation7 + $0x640] sm:$0xff]  ;;  %v633_v55 = vld [vmem:[#allocation7 + $0x668] sm:$0xff] }
  0xe9   :  { %3573 = vmatprep.mubr.bf16.mxu0 %v5185_v20  ;;  %3737 = vmatprep.mubr.bf16.mxu1 %v5185_v20  ;;  %v4397_v27 = vcombine.high %v628_v9, %v632_v23  ;;  %v4399_v28 = vcombine.high %v629_v54, %v633_v55 }
  0xea   :  { %3543 = vmatprep.subr.bf16.mxu0 %v4333_v63  ;;  %3707 = vmatprep.subr.bf16.mxu1 %v4335_v16  ;;  %v624_v63 = vld [vmem:[#allocation7 + $0x620] sm:$0xff]  ;;  %v621_v16 = vld [vmem:[#allocation7 + $0x608] sm:$0xff] }
  0xeb   :  { %v4389_v21 = vcombine.high %v620_v42, %v624_v63  ;;  %v4391_v22 = vcombine.high %v621_v16, %v625_v17 }
  0xec   :  { %3544 = vmatpush1.bf16.msra.mxu0 %v4332_v56  ;;  %3708 = vmatpush1.bf16.msra.mxu1 %v4334_v59  ;;  %v4190_v56 = vmul.f32 -1.442695, %v5155_v45  ;;  %v4388_v59 = vcombine.low %v620_v42, %v624_v63  ;;  %v4405_v45 = vcombine.high %v636_v29, %v640_v48  ;;  %v4428_v42 = vcombine.low %v660_v11, %v664_v51  ;;  %v713_v11 = vld [vmem:[#allocation7 + $0x8e8] sm:$0xff] }
  0xed   :  { %3545 = vmatprep.subr.bf16.mxu0 %v4341_v24  ;;  %3709 = vmatprep.subr.bf16.mxu1 %v4343_v26  ;;  %v4390_v24 = vcombine.low %v621_v16, %v625_v17  ;;  %v4193_v26 = vmul.f32 -1.442695, %v5157_v40  ;;  %v648_v40 = vld [vmem:[#allocation7 + $0x6e0] sm:$0xff] }
  0xee   :  { %4784 = vpow2.f32 %v4190_v56  ;;  %v684_v56 = vld [vmem:[#allocation7 + $0x800] sm:$0xff] }
  0xef   :  { %4786 = vpow2.f32 %v4193_v26  ;;  %v689_v26 = vld [vmem:[#allocation7 + $0x828] sm:$0xff] }
  0xf0   :  { %3546 = vmatpush1.bf16.msra.mxu0 %v4340_v30  ;;  %3710 = vmatpush1.bf16.msra.mxu1 %v4342_v31  ;;  %v637_v30 = vld [vmem:[#allocation7 + $0x688] sm:$0xff] }
  0xf1   :  { %3547 = vmatprep.subr.bf16.mxu0 %v4349_v47  ;;  %3711 = vmatprep.subr.bf16.mxu1 %v4351_v32  ;;  %v641_v31 = vld [vmem:[#allocation7 + $0x6a8] sm:$0xff]  ;;  %v4396_v47 = vcombine.low %v628_v9, %v632_v23  ;;  %v4398_v32 = vcombine.low %v629_v54, %v633_v55 }
  0xf2   :  { %v4407_v33 = vcombine.high %v637_v30, %v641_v31 }
  0xf4   :  { %3548 = vmatpush1.bf16.msra.mxu0 %v4348_v44  ;;  %3712 = vmatpush1.bf16.msra.mxu1 %v4350_v60  ;;  %v4404_v44 = vcombine.low %v636_v29, %v640_v48  ;;  %v4406_v60 = vcombine.low %v637_v30, %v641_v31  ;;  %v692_v31 = vld [vmem:[#allocation7 + $0x840] sm:$0xff] }
  0xf5   :  { %3549 = vmatprep.subr.bf16.mxu0 %v4357_v46  ;;  %3713 = vmatprep.subr.bf16.mxu1 %v4359_v25  ;;  %v4413_v46 = vcombine.high %v644_v37, %v648_v40  ;;  %v4415_v25 = vcombine.high %v645_v41, %v649_v49 }
  0xf8   :  { %3550 = vmatpush1.bf16.msra.mxu0 %v4356_v7  ;;  %3714 = vmatpush1.bf16.msra.mxu1 %v4358_v8  ;;  %v4412_v7 = vcombine.low %v644_v37, %v648_v40  ;;  %v4414_v8 = vcombine.low %v645_v41, %v649_v49 }
  0xf9   :  { %3551 = vmatprep.subr.bf16.mxu0 %v4365_v4  ;;  %3715 = vmatprep.subr.bf16.mxu1 %v4367_v52  ;;  %v4785_v4 = vpop.eup %4784  ;;  %v4421_v52 = vcombine.high %v652_v62, %v656_v2 }
  0xfa   :  { %v4787_v50 = vpop.eup %4786  ;;  %v398_v43 = vadd.f32 1.0, %v4785_v4  ;;  %v708_v4 = vld [vmem:[#allocation7 + $0x8c0] sm:$0xff] }
  0xfc   :  { %3552 = vmatpush1.bf16.msra.mxu0 %v4364_v12  ;;  %3716 = vmatpush1.bf16.msra.mxu1 %v4366_v58  ;;  %v661_v12 = vld [vmem:[#allocation7 + $0x748] sm:$0xff]  ;;  %4788 = vrcp.f32 %v398_v43 }
  0xfd   :  { %3553 = vmatprep.subr.bf16.mxu0 %v4373_v13  ;;  %3717 = vmatprep.subr.bf16.mxu1 %v4375_v14  ;;  %v665_v58 = vld [vmem:[#allocation7 + $0x768] sm:$0xff]  ;;  %v4420_v13 = vcombine.low %v652_v62, %v656_v2  ;;  %v4422_v14 = vcombine.low %v653_v3, %v657_v6 }
  0xfe   :  { %v4431_v34 = vcombine.high %v661_v12, %v665_v58  ;;  %v4430_v63 = vcombine.low %v661_v12, %v665_v58  ;;  %v701_v62 = vld [vmem:[#allocation7 + $0x888] sm:$0xff] }
  0xff   :  { %v705_v2 = vld [vmem:[#allocation7 + $0x8a8] sm:$0xff] }
 0x100   :  { %3554 = vmatpush1.bf16.msra.mxu0 %v4372_v61  ;;  %3718 = vmatpush1.bf16.msra.mxu1 %v4374_v39  ;;  %v401_v61 = vadd.f32 1.0, %v4787_v50  ;;  %v672_v39 = vld [vmem:[#allocation7 + $0x7a0] sm:$0xff]  ;;  %v4470_v51 = vcombine.low %v701_v62, %v705_v2  ;;  %v717_v43 = vld [vmem:[#allocation7 + $0x908] sm:$0xff] }
 0x101   :  { %3555 = vmatprep.subr.bf16.mxu0 %v4381_v1  ;;  %3719 = vmatprep.subr.bf16.mxu1 %v4383_v36  ;;  %v669_v1 = vld [vmem:[#allocation7 + $0x788] sm:$0xff]  ;;  %v4437_v16 = vcombine.high %v668_v38, %v672_v39  ;;  %v4436_v9 = vcombine.low %v668_v38, %v672_v39 }
 0x102   :  { %v673_v36 = vld [vmem:[#allocation7 + $0x7a8] sm:$0xff]  ;;  %4790 = vrcp.f32 %v401_v61 }
 0x103   :  { %v4439_v17 = vcombine.high %v669_v1, %v673_v36  ;;  %v4438_v23 = vcombine.low %v669_v1, %v673_v36  ;;  %v724_v1 = vld [vmem:[#allocation7 + $0x940] sm:$0xff] }
 0x104   :  { %3556 = vmatpush1.bf16.msra.mxu0 %v4380_v18  ;;  %3720 = vmatpush1.bf16.msra.mxu1 %v4382_v19  ;;  %v676_v18 = vld [vmem:[#allocation7 + $0x7c0] sm:$0xff] }
 0x105   :  { %3557 = vmatprep.subr.bf16.mxu0 %v4389_v21  ;;  %3721 = vmatprep.subr.bf16.mxu1 %v4391_v22  ;;  %v680_v19 = vld [vmem:[#allocation7 + $0x7e0] sm:$0xff]  ;;  %v677_v21 = vld [vmem:[#allocation7 + $0x7c8] sm:$0xff] }
 0x106   :  { %v681_v22 = vld [vmem:[#allocation7 + $0x7e8] sm:$0xff]  ;;  %v4445_v54 = vcombine.high %v676_v18, %v680_v19  ;;  %v4789_v30 = vpop.eup %4788  ;;  %v728_v36 = vld [vmem:[#allocation7 + $0x960] sm:$0xff] }
 0x107   :  { %v4447_v55 = vcombine.high %v677_v21, %v681_v22  ;;  %v5197_v40 = vpack.c.bf16 %v4789_v30, %v4789_v30 }
 0x108   :  { %3558 = vmatpush1.bf16.msra.mxu0 %v4388_v59  ;;  %3722 = vmatpush1.bf16.msra.mxu1 %v4390_v24  ;;  %v688_v59 = vld [vmem:[#allocation7 + $0x820] sm:$0xff]  ;;  %v685_v24 = vld [vmem:[#allocation7 + $0x808] sm:$0xff] }
 0x109   :  { %3559 = vmatprep.subr.bf16.mxu0 %v4397_v27  ;;  %3723 = vmatprep.subr.bf16.mxu1 %v4399_v28  ;;  %v4444_v27 = vcombine.low %v676_v18, %v680_v19  ;;  %v4446_v28 = vcombine.low %v677_v21, %v681_v22  ;;  %v4453_v29 = vcombine.high %v684_v56, %v688_v59  ;;  %v732_v21 = vld [vmem:[#allocation7 + $0x980] sm:$0xff] }
 0x10a   :  { %v4455_v48 = vcombine.high %v685_v24, %v689_v26  ;;  %v4452_v37 = vcombine.low %v684_v56, %v688_v59  ;;  %v4454_v41 = vcombine.low %v685_v24, %v689_v26  ;;  %v4493_v18 = vcombine.high %v724_v1, %v728_v36  ;;  %v736_v22 = vld [vmem:[#allocation7 + $0x9a0] sm:$0xff] }
 0x10b   :  { %v4501_v56 = vcombine.high %v732_v21, %v736_v22  ;;  %v740_v24 = vld [vmem:[#allocation7 + $0x9c0] sm:$0xff] }
 0x10c   :  { %3560 = vmatpush1.bf16.msra.mxu0 %v4396_v47  ;;  %3724 = vmatpush1.bf16.msra.mxu1 %v4398_v32  ;;  %v4791_v47 = vpop.eup %4790  ;;  %v696_v32 = vld [vmem:[#allocation7 + $0x860] sm:$0xff] }
 0x10d   :  { %3561 = vmatprep.subr.bf16.mxu0 %v4405_v45  ;;  %3725 = vmatprep.subr.bf16.mxu1 %v4407_v33  ;;  %v693_v45 = vld [vmem:[#allocation7 + $0x848] sm:$0xff]  ;;  %v5199_v49 = vpack.c.bf16 %v4791_v47, %v4791_v47  ;;  %v4460_v3 = vcombine.low %v692_v31, %v696_v32  ;;  %v744_v26 = vld [vmem:[#allocation7 + $0x9e0] sm:$0xff] }
 0x10e   :  { %v697_v33 = vld [vmem:[#allocation7 + $0x868] sm:$0xff]  ;;  %v4509_v30 = vcombine.high %v740_v24, %v744_v26  ;;  %v748_v47 = vld [vmem:[#allocation7 + $0xa00] sm:$0xff] }
 0x10f   :  { %v4462_v6 = vcombine.low %v693_v45, %v697_v33 }
 0x110   :  { %3562 = vmatpush1.bf16.msra.mxu0 %v4404_v44  ;;  %3726 = vmatpush1.bf16.msra.mxu1 %v4406_v60  ;;  %v4461_v44 = vcombine.high %v692_v31, %v696_v32  ;;  %v4463_v60 = vcombine.high %v693_v45, %v697_v33  ;;  %v752_v32 = vld [vmem:[#allocation7 + $0xa20] sm:$0xff]  ;;  %v749_v45 = vld [vmem:[#allocation7 + $0xa08] sm:$0xff] }
 0x111   :  { %3563 = vmatprep.subr.bf16.mxu0 %v4413_v46  ;;  %3727 = vmatprep.subr.bf16.mxu1 %v4415_v25  ;;  %v700_v46 = vld [vmem:[#allocation7 + $0x880] sm:$0xff]  ;;  %v753_v33 = vld [vmem:[#allocation7 + $0xa28] sm:$0xff] }
 0x112   :  { %v704_v25 = vld [vmem:[#allocation7 + $0x8a0] sm:$0xff] }
 0x113   :  { %v4468_v50 = vcombine.low %v700_v46, %v704_v25 }
 0x114   :  { %3564 = vmatpush1.bf16.msra.mxu0 %v4412_v7  ;;  %3728 = vmatpush1.bf16.msra.mxu1 %v4414_v8  ;;  %v4469_v7 = vcombine.high %v700_v46, %v704_v25  ;;  %v4471_v8 = vcombine.high %v701_v62, %v705_v2  ;;  %v756_v46 = vld [vmem:[#allocation7 + $0xa40] sm:$0xff]  ;;  %v757_v62 = vld [vmem:[#allocation7 + $0xa48] sm:$0xff] }
 0x115   :  { %3565 = vmatprep.subr.bf16.mxu0 %v4421_v52  ;;  %3729 = vmatprep.subr.bf16.mxu1 %v4423_v10  ;;  %v712_v52 = vld [vmem:[#allocation7 + $0x8e0] sm:$0xff]  ;;  %v709_v10 = vld [vmem:[#allocation7 + $0x8c8] sm:$0xff] }
 0x116   :  { %v4477_v12 = vcombine.high %v708_v4, %v712_v52  ;;  %v4479_v58 = vcombine.high %v709_v10, %v713_v11  ;;  %v4478_v38 = vcombine.low %v709_v10, %v713_v11  ;;  %v760_v25 = vld [vmem:[#allocation7 + $0xa60] sm:$0xff]  ;;  %v761_v2 = vld [vmem:[#allocation7 + $0xa68] sm:$0xff] }
 0x117   :  { %v764_v10 = vld [vmem:[#allocation7 + $0xa80] sm:$0xff] }
 0x118   :  { %3566 = vmatpush1.bf16.msra.mxu0 %v4420_v13  ;;  %3730 = vmatpush1.bf16.msra.mxu1 %v4422_v14  ;;  %v716_v13 = vld [vmem:[#allocation7 + $0x900] sm:$0xff] }
 0x119   :  { %3567 = vmatprep.subr.bf16.mxu0 %v4429_v57  ;;  %3731 = vmatprep.subr.bf16.mxu1 %v4431_v34  ;;  %v720_v14 = vld [vmem:[#allocation7 + $0x920] sm:$0xff]  ;;  %v721_v57 = vld [vmem:[#allocation7 + $0x928] sm:$0xff]  ;;  %v4476_v34 = vcombine.low %v708_v4, %v712_v52  ;;  %v4195_v4 = vmul.f32 -1.442695, %v5173_v5  ;;  %v4527_v52 = vcombine.high %v757_v62, %v761_v2 }
 0x11a   :  { %v4485_v61 = vcombine.high %v716_v13, %v720_v14  ;;  %v4487_v39 = vcombine.high %v717_v43, %v721_v57  ;;  %v768_v11 = vld [vmem:[#allocation7 + $0xaa0] sm:$0xff]  ;;  %v777_v5 = vld [vmem:[#allocation7 + $0xae8] sm:$0xff] }
 0x11c   :  { %3568 = vmatpush1.bf16.msra.mxu0 %v4428_v42  ;;  %3732 = vmatpush1.bf16.msra.mxu1 %v4430_v63  ;;  %v725_v42 = vld [vmem:[#allocation7 + $0x948] sm:$0xff] }
 0x11d   :  { %3569 = vmatprep.subr.bf16.mxu0 %v4437_v16  ;;  %3733 = vmatprep.subr.bf16.mxu1 %v4439_v17  ;;  %v729_v63 = vld [vmem:[#allocation7 + $0x968] sm:$0xff]  ;;  %v4484_v16 = vcombine.low %v716_v13, %v720_v14  ;;  %v4486_v17 = vcombine.low %v717_v43, %v721_v57  ;;  %v772_v14 = vld [vmem:[#allocation7 + $0xac0] sm:$0xff] }
 0x11e   :  { %v4495_v19 = vcombine.high %v725_v42, %v729_v63  ;;  %v776_v43 = vld [vmem:[#allocation7 + $0xae0] sm:$0xff]  ;;  %v773_v57 = vld [vmem:[#allocation7 + $0xac8] sm:$0xff] }
 0x120   :  { %3570 = vmatpush1.bf16.msra.mxu0 %v4436_v9  ;;  %3734 = vmatpush1.bf16.msra.mxu1 %v4438_v23  ;;  %v733_v9 = vld [vmem:[#allocation7 + $0x988] sm:$0xff] }
 0x121   :  { %3571 = vmatprep.subr.bf16.mxu0 %v4445_v54  ;;  %3735 = vmatprep.subr.bf16.mxu1 %v4447_v55  ;;  %v737_v23 = vld [vmem:[#allocation7 + $0x9a8] sm:$0xff]  ;;  %v4492_v54 = vcombine.low %v724_v1, %v728_v36  ;;  %v4494_v55 = vcombine.low %v725_v42, %v729_v63  ;;  %v780_v1 = vld [vmem:[#allocation7 + $0xb00] sm:$0xff] }
 0x122   :  { %v4503_v59 = vcombine.high %v733_v9, %v737_v23  ;;  %v784_v36 = vld [vmem:[#allocation7 + $0xb20] sm:$0xff]  ;;  %v781_v42 = vld [vmem:[#allocation7 + $0xb08] sm:$0xff] }
 0x123   :  { %v785_v63 = vld [vmem:[#allocation7 + $0xb28] sm:$0xff] }
 0x124   :  { %3572 = vmatpush1.bf16.msra.mxu0 %v4444_v27  ;;  %3736 = vmatpush1.bf16.msra.mxu1 %v4446_v28  ;;  %v741_v27 = vld [vmem:[#allocation7 + $0x9c8] sm:$0xff] }
 0x125   :  { %3582 = vmatprep.subr.bf16.mxu0 %v4453_v29  ;;  %3746 = vmatprep.subr.bf16.mxu1 %v4455_v48  ;;  %v745_v28 = vld [vmem:[#allocation7 + $0x9e8] sm:$0xff]  ;;  %v4500_v29 = vcombine.low %v732_v21, %v736_v22  ;;  %v4502_v48 = vcombine.low %v733_v9, %v737_v23  ;;  %v4551_v21 = vcombine.high %v781_v42, %v785_v63  ;;  %v788_v22 = vld [vmem:[#allocation7 + $0xb40] sm:$0xff] }
 0x126   :  { %v4511_v31 = vcombine.high %v741_v27, %v745_v28  ;;  %v792_v9 = vld [vmem:[#allocation7 + $0xb60] sm:$0xff] }
 0x127   :  { %3574 = vmatmul.mubr.bf16.vlgmr.msra.gmra.mrb[0].mxu0 %v5197_v40  ;;  %3738 = vmatmul.mubr.bf16.vlgmr.msra.gmra.mrb[0].mxu1 %v5197_v40 }
 0x128   :  { %3583 = vmatpush1.bf16.msra.mxu0 %v4452_v37  ;;  %3614 = vmatprep.mubr.bf16.mxu0 %v5199_v49  ;;  %v4508_v37 = vcombine.low %v740_v24, %v744_v26  ;;  %v4550_v24 = vcombine.low %v781_v42, %v785_v63  ;;  %v4557_v26 = vcombine.high %v788_v22, %v792_v9 }
 0x129   :  { %3747 = vmatpush1.bf16.msra.mxu1 %v4454_v41  ;;  %3778 = vmatprep.mubr.bf16.mxu1 %v5199_v49  ;;  %v4510_v41 = vcombine.low %v741_v27, %v745_v28  ;;  %v796_v28 = vld [vmem:[#allocation7 + $0xb80] sm:$0xff] }
 0x12a   :  { %3584 = vmatprep.subr.bf16.mxu0 %v4461_v44  ;;  %3748 = vmatprep.subr.bf16.mxu1 %v4463_v60  ;;  %v4517_v44 = vcombine.high %v748_v47, %v752_v32  ;;  %v4519_v60 = vcombine.high %v749_v45, %v753_v33 }
 0x12c   :  { %3585 = vmatpush1.bf16.msra.mxu0 %v4460_v3  ;;  %v4192_v3 = vmul.f32 -1.442695, %v5171_v35  ;;  %v4526_v35 = vcombine.low %v757_v62, %v761_v2 }
 0x12d   :  { %3749 = vmatpush1.bf16.msra.mxu1 %v4462_v6  ;;  %3586 = vmatprep.subr.bf16.mxu0 %v4469_v7  ;;  %v4516_v6 = vcombine.low %v748_v47, %v752_v32  ;;  %v4518_v7 = vcombine.low %v749_v45, %v753_v33  ;;  %v4556_v47 = vcombine.low %v788_v22, %v792_v9  ;;  %v841_v22 = vld [vmem:[#allocation7 + $0xce8] sm:$0xff] }
 0x12e   :  { %3750 = vmatprep.subr.bf16.mxu1 %v4471_v8  ;;  %v4525_v8 = vcombine.high %v756_v46, %v760_v25  ;;  %4792 = vpow2.f32 %v4192_v3  ;;  %v812_v3 = vld [vmem:[#allocation7 + $0xc00] sm:$0xff] }
 0x12f   :  { %4794 = vpow2.f32 %v4195_v4 }
 0x130   :  { %3587 = vmatpush1.bf16.msra.mxu0 %v4468_v50  ;;  %v765_v50 = vld [vmem:[#allocation7 + $0xa88] sm:$0xff] }
 0x131   :  { %3751 = vmatpush1.bf16.msra.mxu1 %v4470_v51  ;;  %3588 = vmatprep.subr.bf16.mxu0 %v4477_v12  ;;  %v769_v51 = vld [vmem:[#allocation7 + $0xaa8] sm:$0xff]  ;;  %v4524_v12 = vcombine.low %v756_v46, %v760_v25 }
 0x132   :  { %3752 = vmatprep.subr.bf16.mxu1 %v4479_v58  ;;  %v4533_v58 = vcombine.high %v764_v10, %v768_v11  ;;  %v4535_v13 = vcombine.high %v765_v50, %v769_v51 }
 0x134   :  { %3589 = vmatpush1.bf16.msra.mxu0 %v4476_v34  ;;  %v4532_v34 = vcombine.low %v764_v10, %v768_v11 }
 0x135   :  { %3753 = vmatpush1.bf16.msra.mxu1 %v4478_v38  ;;  %3590 = vmatprep.subr.bf16.mxu0 %v4485_v61  ;;  %v4534_v38 = vcombine.low %v765_v50, %v769_v51  ;;  %v4541_v61 = vcombine.high %v772_v14, %v776_v43  ;;  %v820_v51 = vld [vmem:[#allocation7 + $0xc40] sm:$0xff] }
 0x136   :  { %3754 = vmatprep.subr.bf16.mxu1 %v4487_v39  ;;  %v4543_v39 = vcombine.high %v773_v57, %v777_v5 }
 0x138   :  { %3591 = vmatpush1.bf16.msra.mxu0 %v4484_v16  ;;  %v4540_v16 = vcombine.low %v772_v14, %v776_v43  ;;  %v825_v14 = vld [vmem:[#allocation7 + $0xc68] sm:$0xff] }
 0x139   :  { %3755 = vmatpush1.bf16.msra.mxu1 %v4486_v17  ;;  %3592 = vmatprep.subr.bf16.mxu0 %v4493_v18  ;;  %v4793_v17 = vpop.eup %4792  ;;  %v4542_v18 = vcombine.low %v773_v57, %v777_v5 }
 0x13a   :  { %3756 = vmatprep.subr.bf16.mxu1 %v4495_v19  ;;  %v4549_v19 = vcombine.high %v780_v1, %v784_v36  ;;  %v4795_v23 = vpop.eup %4794 }
 0x13c   :  { %3593 = vmatpush1.bf16.msra.mxu0 %v4492_v54  ;;  %v789_v54 = vld [vmem:[#allocation7 + $0xb48] sm:$0xff] }
 0x13d   :  { %3757 = vmatpush1.bf16.msra.mxu1 %v4494_v55  ;;  %3594 = vmatprep.subr.bf16.mxu0 %v4501_v56  ;;  %v793_v55 = vld [vmem:[#allocation7 + $0xb68] sm:$0xff]  ;;  %v4548_v56 = vcombine.low %v780_v1, %v784_v36 }
 0x13e   :  { %3758 = vmatprep.subr.bf16.mxu1 %v4503_v59  ;;  %v400_v59 = vadd.f32 1.0, %v4793_v17  ;;  %v4559_v27 = vcombine.high %v789_v54, %v793_v55  ;;  %v4558_v32 = vcombine.low %v789_v54, %v793_v55  ;;  %v829_v1 = vld [vmem:[#allocation7 + $0xc88] sm:$0xff] }
 0x13f   :  { %v833_v36 = vld [vmem:[#allocation7 + $0xca8] sm:$0xff] }
 0x140   :  { %3595 = vmatpush1.bf16.msra.mxu0 %v4500_v29  ;;  %v800_v29 = vld [vmem:[#allocation7 + $0xba0] sm:$0xff]  ;;  %4796 = vrcp.f32 %v400_v59  ;;  %v4599_v17 = vcombine.high %v829_v1, %v833_v36 }
 0x141   :  { %3759 = vmatpush1.bf16.msra.mxu1 %v4502_v48  ;;  %3596 = vmatprep.subr.bf16.mxu0 %v4509_v30  ;;  %v403_v48 = vadd.f32 1.0, %v4795_v23  ;;  %v797_v30 = vld [vmem:[#allocation7 + $0xb88] sm:$0xff]  ;;  %v4565_v45 = vcombine.high %v796_v28, %v800_v29  ;;  %v4564_v46 = vcombine.low %v796_v28, %v800_v29  ;;  %v4598_v23 = vcombine.low %v829_v1, %v833_v36  ;;  %v848_v59 = vld [vmem:[#allocation7 + $0xd20] sm:$0xff] }
 0x142   :  { %3760 = vmatprep.subr.bf16.mxu1 %v4511_v31  ;;  %v801_v31 = vld [vmem:[#allocation7 + $0xba8] sm:$0xff] }
 0x143   :  { %v4567_v33 = vcombine.high %v797_v30, %v801_v31  ;;  %4798 = vrcp.f32 %v403_v48  ;;  %v4566_v25 = vcombine.low %v797_v30, %v801_v31  ;;  %v852_v30 = vld [vmem:[#allocation7 + $0xd40] sm:$0xff]  ;;  %v885_v1 = vld [vmem:[#allocation7 + $0xe48] sm:$0xff] }
 0x144   :  { %3597 = vmatpush1.bf16.msra.mxu0 %v4508_v37  ;;  %v804_v37 = vld [vmem:[#allocation7 + $0xbc0] sm:$0xff]  ;;  %v889_v36 = vld [vmem:[#allocation7 + $0xe68] sm:$0xff] }
 0x145   :  { %3761 = vmatpush1.bf16.msra.mxu1 %v4510_v41  ;;  %3598 = vmatprep.subr.bf16.mxu0 %v4517_v44  ;;  %v808_v41 = vld [vmem:[#allocation7 + $0xbe0] sm:$0xff]  ;;  %v805_v44 = vld [vmem:[#allocation7 + $0xbc8] sm:$0xff] }
 0x146   :  { %3762 = vmatprep.subr.bf16.mxu1 %v4519_v60  ;;  %v809_v60 = vld [vmem:[#allocation7 + $0xbe8] sm:$0xff]  ;;  %v4573_v62 = vcombine.high %v804_v37, %v808_v41  ;;  %v4572_v4 = vcombine.low %v804_v37, %v808_v41  ;;  %v856_v31 = vld [vmem:[#allocation7 + $0xd60] sm:$0xff] }
 0x147   :  { %v4575_v2 = vcombine.high %v805_v44, %v809_v60  ;;  %v4621_v37 = vcombine.high %v852_v30, %v856_v31 }
 0x148   :  { %3599 = vmatpush1.bf16.msra.mxu0 %v4516_v6  ;;  %v816_v6 = vld [vmem:[#allocation7 + $0xc20] sm:$0xff] }
 0x149   :  { %3763 = vmatpush1.bf16.msra.mxu1 %v4518_v7  ;;  %3600 = vmatprep.subr.bf16.mxu0 %v4525_v8  ;;  %v813_v7 = vld [vmem:[#allocation7 + $0xc08] sm:$0xff]  ;;  %v4581_v10 = vcombine.high %v812_v3, %v816_v6 }
 0x14a   :  { %3764 = vmatprep.subr.bf16.mxu1 %v4527_v52  ;;  %v817_v8 = vld [vmem:[#allocation7 + $0xc28] sm:$0xff]  ;;  %v4574_v52 = vcombine.low %v805_v44, %v809_v60  ;;  %v4797_v11 = vpop.eup %4796  ;;  %v860_v44 = vld [vmem:[#allocation7 + $0xd80] sm:$0xff] }
 0x14b   :  { %v4583_v50 = vcombine.high %v813_v7, %v817_v8  ;;  %v5207_v43 = vpack.c.bf16 %v4797_v11, %v4797_v11  ;;  %v4582_v57 = vcombine.low %v813_v7, %v817_v8  ;;  %v864_v60 = vld [vmem:[#allocation7 + $0xda0] sm:$0xff] }
 0x14c   :  { %3601 = vmatpush1.bf16.msra.mxu0 %v4524_v12  ;;  %v824_v12 = vld [vmem:[#allocation7 + $0xc60] sm:$0xff] }
 0x14d   :  { %3765 = vmatpush1.bf16.msra.mxu1 %v4526_v35  ;;  %3602 = vmatprep.subr.bf16.mxu0 %v4533_v58  ;;  %v4799_v35 = vpop.eup %4798  ;;  %v4580_v58 = vcombine.low %v812_v3, %v816_v6  ;;  %v4589_v5 = vcombine.high %v820_v51, %v824_v12  ;;  %v4588_v42 = vcombine.low %v820_v51, %v824_v12  ;;  %v868_v7 = vld [vmem:[#allocation7 + $0xdc0] sm:$0xff] }
 0x14e   :  { %3766 = vmatprep.subr.bf16.mxu1 %v4535_v13  ;;  %v821_v13 = vld [vmem:[#allocation7 + $0xc48] sm:$0xff]  ;;  %v4629_v3 = vcombine.high %v860_v44, %v864_v60  ;;  %v872_v8 = vld [vmem:[#allocation7 + $0xde0] sm:$0xff] }
 0x14f   :  { %v4590_v63 = vcombine.low %v821_v13, %v825_v14  ;;  %v876_v12 = vld [vmem:[#allocation7 + $0xe00] sm:$0xff] }
 0x150   :  { %3603 = vmatpush1.bf16.msra.mxu0 %v4532_v34  ;;  %v828_v34 = vld [vmem:[#allocation7 + $0xc80] sm:$0xff] }
 0x151   :  { %3767 = vmatpush1.bf16.msra.mxu1 %v4534_v38  ;;  %3604 = vmatprep.subr.bf16.mxu0 %v4541_v61  ;;  %v832_v38 = vld [vmem:[#allocation7 + $0xca0] sm:$0xff]  ;;  %v5210_v61 = vpack.c.bf16 %v4799_v35, %v4799_v35 }
 0x152   :  { %3768 = vmatprep.subr.bf16.mxu1 %v4543_v39  ;;  %v4591_v39 = vcombine.high %v821_v13, %v825_v14  ;;  %v4596_v9 = vcombine.low %v828_v34, %v832_v38  ;;  %v880_v35 = vld [vmem:[#allocation7 + $0xe20] sm:$0xff]  ;;  %v881_v13 = vld [vmem:[#allocation7 + $0xe28] sm:$0xff]  ;;  %v4636_v14 = vcombine.low %v868_v7, %v872_v8 }
 0x154   :  { %3605 = vmatpush1.bf16.msra.mxu0 %v4540_v16  ;;  %v4597_v16 = vcombine.high %v828_v34, %v832_v38  ;;  %v884_v38 = vld [vmem:[#allocation7 + $0xe40] sm:$0xff] }
 0x155   :  { %3769 = vmatpush1.bf16.msra.mxu1 %v4542_v18  ;;  %3606 = vmatprep.subr.bf16.mxu0 %v4549_v19  ;;  %v836_v18 = vld [vmem:[#allocation7 + $0xcc0] sm:$0xff] }
 0x156   :  { %3770 = vmatprep.subr.bf16.mxu1 %v4551_v21  ;;  %v840_v19 = vld [vmem:[#allocation7 + $0xce0] sm:$0xff]  ;;  %v837_v21 = vld [vmem:[#allocation7 + $0xcc8] sm:$0xff] }
 0x157   :  { %v4605_v54 = vcombine.high %v836_v18, %v840_v19  ;;  %v4607_v55 = vcombine.high %v837_v21, %v841_v22  ;;  %v4606_v28 = vcombine.low %v837_v21, %v841_v22  ;;  %v896_v21 = vld [vmem:[#allocation7 + $0xea0] sm:$0xff]  ;;  %v893_v22 = vld [vmem:[#allocation7 + $0xe88] sm:$0xff] }
 0x158   :  { %3607 = vmatpush1.bf16.msra.mxu0 %v4548_v56  ;;  %v844_v56 = vld [vmem:[#allocation7 + $0xd00] sm:$0xff] }
 0x159   :  { %3771 = vmatpush1.bf16.msra.mxu1 %v4550_v24  ;;  %3608 = vmatprep.subr.bf16.mxu0 %v4557_v26  ;;  %v845_v24 = vld [vmem:[#allocation7 + $0xd08] sm:$0xff]  ;;  %v4613_v29 = vcombine.high %v844_v56, %v848_v59 }
 0x15a   :  { %3772 = vmatprep.subr.bf16.mxu1 %v4559_v27  ;;  %v849_v26 = vld [vmem:[#allocation7 + $0xd28] sm:$0xff]  ;;  %v4604_v27 = vcombine.low %v836_v18, %v840_v19  ;;  %v4655_v18 = vcombine.high %v885_v1, %v889_v36  ;;  %v892_v19 = vld [vmem:[#allocation7 + $0xe80] sm:$0xff] }
 0x15b   :  { %v4615_v48 = vcombine.high %v845_v24, %v849_v26 }
 0x15c   :  { %3609 = vmatpush1.bf16.msra.mxu0 %v4556_v47  ;;  %v853_v47 = vld [vmem:[#allocation7 + $0xd48] sm:$0xff] }
 0x15d   :  { %3773 = vmatpush1.bf16.msra.mxu1 %v4558_v32  ;;  %3610 = vmatprep.subr.bf16.mxu0 %v4565_v45  ;;  %v857_v32 = vld [vmem:[#allocation7 + $0xd68] sm:$0xff]  ;;  %v4612_v45 = vcombine.low %v844_v56, %v848_v59  ;;  %v900_v56 = vld [vmem:[#allocation7 + $0xec0] sm:$0xff] }
 0x15e   :  { %3774 = vmatprep.subr.bf16.mxu1 %v4567_v33  ;;  %v4614_v33 = vcombine.low %v845_v24, %v849_v26  ;;  %v4623_v41 = vcombine.high %v853_v47, %v857_v32  ;;  %v904_v59 = vld [vmem:[#allocation7 + $0xee0] sm:$0xff]  ;;  %v901_v24 = vld [vmem:[#allocation7 + $0xec8] sm:$0xff] }
 0x15f   :  { %v905_v26 = vld [vmem:[#allocation7 + $0xee8] sm:$0xff] }
 0x160   :  { %3611 = vmatpush1.bf16.msra.mxu0 %v4564_v46  ;;  %v861_v46 = vld [vmem:[#allocation7 + $0xd88] sm:$0xff] }
 0x161   :  { %3775 = vmatpush1.bf16.msra.mxu1 %v4566_v25  ;;  %3612 = vmatprep.subr.bf16.mxu0 %v4573_v62  ;;  %v865_v25 = vld [vmem:[#allocation7 + $0xda8] sm:$0xff]  ;;  %v4620_v62 = vcombine.low %v852_v30, %v856_v31  ;;  %v908_v30 = vld [vmem:[#allocation7 + $0xf00] sm:$0xff] }
 0x162   :  { %3776 = vmatprep.subr.bf16.mxu1 %v4575_v2  ;;  %v4622_v2 = vcombine.low %v853_v47, %v857_v32  ;;  %v4631_v6 = vcombine.high %v861_v46, %v865_v25  ;;  %v4630_v11 = vcombine.low %v861_v46, %v865_v25  ;;  %v912_v31 = vld [vmem:[#allocation7 + $0xf20] sm:$0xff]  ;;  %v909_v47 = vld [vmem:[#allocation7 + $0xf08] sm:$0xff] }
 0x163   :  { %v913_v32 = vld [vmem:[#allocation7 + $0xf28] sm:$0xff]  ;;  %v920_v46 = vld [vmem:[#allocation7 + $0xf60] sm:$0xff] }
 0x164   :  { %3613 = vmatpush1.bf16.msra.mxu0 %v4572_v4  ;;  %v869_v4 = vld [vmem:[#allocation7 + $0xdc8] sm:$0xff] }
 0x165   :  { %3777 = vmatpush1.bf16.msra.mxu1 %v4574_v52  ;;  %3623 = vmatprep.subr.bf16.mxu0 %v4581_v10  ;;  %v873_v52 = vld [vmem:[#allocation7 + $0xde8] sm:$0xff]  ;;  %v4628_v10 = vcombine.low %v860_v44, %v864_v60  ;;  %v4679_v44 = vcombine.high %v909_v47, %v913_v32  ;;  %v916_v60 = vld [vmem:[#allocation7 + $0xf40] sm:$0xff] }
 0x166   :  { %3787 = vmatprep.subr.bf16.mxu1 %v4583_v50  ;;  %v4637_v50 = vcombine.high %v868_v7, %v872_v8  ;;  %v4639_v51 = vcombine.high %v869_v4, %v873_v52  ;;  %v917_v25 = vld [vmem:[#allocation7 + $0xf48] sm:$0xff]  ;;  %v4685_v7 = vcombine.high %v916_v60, %v920_v46 }
 0x167   :  { %3615 = vmatmul.mubr.bf16.vlgmr.msra.gmra.mrb[0].mxu0 %v5207_v43 }
 0x168   :  { %3779 = vmatmul.mubr.bf16.vlgmr.msra.gmra.mrb[0].mxu1 %v5207_v43  ;;  %3624 = vmatpush1.bf16.msra.mxu0 %v4580_v58  ;;  %v877_v58 = vld [vmem:[#allocation7 + $0xe08] sm:$0xff] }
 0x169   :  { %3655 = vmatprep.mubr.bf16.mxu0 %v5210_v61  ;;  %3788 = vmatpush1.bf16.msra.mxu1 %v4582_v57  ;;  %v4638_v57 = vcombine.low %v869_v4, %v873_v52  ;;  %v4647_v34 = vcombine.high %v877_v58, %v881_v13  ;;  %v924_v4 = vld [vmem:[#allocation7 + $0xf80] sm:$0xff] }
 0x16a   :  { %3819 = vmatprep.mubr.bf16.mxu1 %v5210_v61  ;;  %3625 = vmatprep.subr.bf16.mxu0 %v4589_v5  ;;  %v4645_v5 = vcombine.high %v876_v12, %v880_v35  ;;  %v928_v52 = vld [vmem:[#allocation7 + $0xfa0] sm:$0xff] }
 0x16b   :  { %3789 = vmatprep.subr.bf16.mxu1 %v4591_v39  ;;  %v888_v39 = vld [vmem:[#allocation7 + $0xe60] sm:$0xff] }
 0x16c   :  { %3626 = vmatpush1.bf16.msra.mxu0 %v4588_v42  ;;  %v4194_v42 = vmul.f32 -1.442695, %v5175_v15 }
 0x16d   :  { %3790 = vmatpush1.bf16.msra.mxu1 %v4590_v63  ;;  %3627 = vmatprep.subr.bf16.mxu0 %v4597_v16  ;;  %v4644_v63 = vcombine.low %v876_v12, %v880_v35  ;;  %v4646_v16 = vcombine.low %v877_v58, %v881_v13  ;;  %v4693_v12 = vcombine.high %v924_v4, %v928_v52  ;;  %v932_v58 = vld [vmem:[#allocation7 + $0xfc0] sm:$0xff] }
 0x16e   :  { %3791 = vmatprep.subr.bf16.mxu1 %v4599_v17  ;;  %v4653_v17 = vcombine.high %v884_v38, %v888_v39  ;;  %4800 = vpow2.f32 %v4194_v42  ;;  %v936_v13 = vld [vmem:[#allocation7 + $0xfe0] sm:$0xff]  ;;  %v431_v42 = vld [vmem:[#allocation7 + $0x18] sm:$0xff] }
 0x170   :  { %3628 = vmatpush1.bf16.msra.mxu0 %v4596_v9  ;;  %v897_v9 = vld [vmem:[#allocation7 + $0xea8] sm:$0xff] }
 0x171   :  { %3792 = vmatpush1.bf16.msra.mxu1 %v4598_v23  ;;  %3629 = vmatprep.subr.bf16.mxu0 %v4605_v54  ;;  %v4652_v23 = vcombine.low %v884_v38, %v888_v39  ;;  %v4654_v54 = vcombine.low %v885_v1, %v889_v36  ;;  %v4663_v15 = vcombine.high %v893_v22, %v897_v9  ;;  %v430_v1 = vld [vmem:[#allocation7 + $0x10] sm:$0xff] }
 0x172   :  { %3793 = vmatprep.subr.bf16.mxu1 %v4607_v55  ;;  %v4661_v55 = vcombine.high %v892_v19, %v896_v21  ;;  %v4701_v38 = vcombine.high %v932_v58, %v936_v13  ;;  %v434_v36 = vld [vmem:[#allocation7 + $0x30] sm:$0xff] }
 0x174   :  { %3630 = vmatpush1.bf16.msra.mxu0 %v4604_v27  ;;  %v4660_v27 = vcombine.low %v892_v19, %v896_v21 }
 0x175   :  { %3794 = vmatpush1.bf16.msra.mxu1 %v4606_v28  ;;  %3631 = vmatprep.subr.bf16.mxu0 %v4613_v29  ;;  %v4662_v28 = vcombine.low %v893_v22, %v897_v9  ;;  %v4669_v29 = vcombine.high %v900_v56, %v904_v59  ;;  %v438_v22 = vld [vmem:[#allocation7 + $0x50] sm:$0xff] }
 0x176   :  { %3795 = vmatprep.subr.bf16.mxu1 %v4615_v48  ;;  %v4671_v48 = vcombine.high %v901_v24, %v905_v26  ;;  %v442_v9 = vld [vmem:[#allocation7 + $0x70] sm:$0xff] }
 0x178   :  { %3632 = vmatpush1.bf16.msra.mxu0 %v4612_v45  ;;  %v4668_v45 = vcombine.low %v900_v56, %v904_v59  ;;  %v4209_v59 = vcombine.high %v438_v22, %v442_v9 }
 0x179   :  { %3796 = vmatpush1.bf16.msra.mxu1 %v4614_v33  ;;  %3633 = vmatprep.subr.bf16.mxu0 %v4621_v37  ;;  %v4801_v33 = vpop.eup %4800  ;;  %v4670_v37 = vcombine.low %v901_v24, %v905_v26  ;;  %v446_v24 = vld [vmem:[#allocation7 + $0x90] sm:$0xff] }
 0x17a   :  { %3797 = vmatprep.subr.bf16.mxu1 %v4623_v41  ;;  %v4677_v41 = vcombine.high %v908_v30, %v912_v31  ;;  %v450_v26 = vld [vmem:[#allocation7 + $0xb0] sm:$0xff] }
 0x17c   :  { %3634 = vmatpush1.bf16.msra.mxu0 %v4620_v62  ;;  %v921_v62 = vld [vmem:[#allocation7 + $0xf68] sm:$0xff] }
 0x17d   :  { %3798 = vmatpush1.bf16.msra.mxu1 %v4622_v2  ;;  %3635 = vmatprep.subr.bf16.mxu0 %v4629_v3  ;;  %v4676_v2 = vcombine.low %v908_v30, %v912_v31  ;;  %v402_v3 = vadd.f32 1.0, %v4801_v33  ;;  %v4687_v8 = vcombine.high %v917_v25, %v921_v62  ;;  %v4217_v31 = vcombine.high %v446_v24, %v450_v26  ;;  %v455_v33 = vld [vmem:[#allocation7 + $0xd8] sm:$0xff] }
 0x17e   :  { %3799 = vmatprep.subr.bf16.mxu1 %v4631_v6  ;;  %v4678_v6 = vcombine.low %v909_v47, %v913_v32  ;;  %v454_v32 = vld [vmem:[#allocation7 + $0xd0] sm:$0xff] }
 0x17f   :  { %4802 = vrcp.f32 %v402_v3  ;;  %v467_v3 = vld [vmem:[#allocation7 + $0x138] sm:$0xff] }
 0x180   :  { %3636 = vmatpush1.bf16.msra.mxu0 %v4628_v10  ;;  %v925_v10 = vld [vmem:[#allocation7 + $0xf88] sm:$0xff] }
 0x181   :  { %3800 = vmatpush1.bf16.msra.mxu1 %v4630_v11  ;;  %3637 = vmatprep.subr.bf16.mxu0 %v4637_v50  ;;  %v929_v11 = vld [vmem:[#allocation7 + $0xfa8] sm:$0xff]  ;;  %v4684_v50 = vcombine.low %v916_v60, %v920_v46 }
 0x182   :  { %3801 = vmatprep.subr.bf16.mxu1 %v4639_v51  ;;  %v4686_v51 = vcombine.low %v917_v25, %v921_v62  ;;  %v4695_v35 = vcombine.high %v925_v10, %v929_v11  ;;  %v462_v25 = vld [vmem:[#allocation7 + $0x110] sm:$0xff] }
 0x183   :  { %v466_v62 = vld [vmem:[#allocation7 + $0x130] sm:$0xff] }
 0x184   :  { %3638 = vmatpush1.bf16.msra.mxu0 %v4636_v14  ;;  %v933_v14 = vld [vmem:[#allocation7 + $0xfc8] sm:$0xff] }
 0x185   :  { %3802 = vmatpush1.bf16.msra.mxu1 %v4638_v57  ;;  %3639 = vmatprep.subr.bf16.mxu0 %v4645_v5  ;;  %v937_v57 = vld [vmem:[#allocation7 + $0xfe8] sm:$0xff]  ;;  %v4692_v5 = vcombine.low %v924_v4, %v928_v52  ;;  %v470_v4 = vld [vmem:[#allocation7 + $0x150] sm:$0xff] }
 0x186   :  { %3803 = vmatprep.subr.bf16.mxu1 %v4647_v34  ;;  %v4694_v34 = vcombine.low %v925_v10, %v929_v11  ;;  %v4703_v39 = vcombine.high %v933_v14, %v937_v57  ;;  %v474_v52 = vld [vmem:[#allocation7 + $0x170] sm:$0xff]  ;;  %v471_v10 = vld [vmem:[#allocation7 + $0x158] sm:$0xff] }
 0x187   :  { %v475_v11 = vld [vmem:[#allocation7 + $0x178] sm:$0xff] }
 0x188   :  { %3640 = vmatpush1.bf16.msra.mxu0 %v4644_v63  ;;  %v435_v63 = vld [vmem:[#allocation7 + $0x38] sm:$0xff] }
 0x189   :  { %3804 = vmatpush1.bf16.msra.mxu1 %v4646_v16  ;;  %3641 = vmatprep.subr.bf16.mxu0 %v4653_v17  ;;  %v4700_v16 = vcombine.low %v932_v58, %v936_v13  ;;  %v4702_v17 = vcombine.low %v933_v14, %v937_v57  ;;  %v4803_v19 = vpop.eup %4802  ;;  %v4203_v21 = vcombine.high %v431_v42, %v435_v63  ;;  %v478_v58 = vld [vmem:[#allocation7 + $0x190] sm:$0xff]  ;;  %v479_v14 = vld [vmem:[#allocation7 + $0x198] sm:$0xff] }
 0x18a   :  { %3805 = vmatprep.subr.bf16.mxu1 %v4655_v18  ;;  %v4201_v18 = vcombine.high %v430_v1, %v434_v36  ;;  %v4202_v56 = vcombine.low %v431_v42, %v435_v63  ;;  %v482_v13 = vld [vmem:[#allocation7 + $0x1b0] sm:$0xff]  ;;  %v483_v57 = vld [vmem:[#allocation7 + $0x1b8] sm:$0xff] }
 0x18b   :  { %v487_v42 = vld [vmem:[#allocation7 + $0x1d8] sm:$0xff] }
 0x18c   :  { %3642 = vmatpush1.bf16.msra.mxu0 %v4652_v23  ;;  %v4200_v23 = vcombine.low %v430_v1, %v434_v36  ;;  %v486_v1 = vld [vmem:[#allocation7 + $0x1d0] sm:$0xff]  ;;  %v491_v63 = vld [vmem:[#allocation7 + $0x1f8] sm:$0xff] }
 0x18d   :  { %3806 = vmatpush1.bf16.msra.mxu1 %v4654_v54  ;;  %3643 = vmatprep.subr.bf16.mxu0 %v4661_v55  ;;  %v439_v54 = vld [vmem:[#allocation7 + $0x58] sm:$0xff]  ;;  %v490_v36 = vld [vmem:[#allocation7 + $0x1f0] sm:$0xff] }
 0x18e   :  { %3807 = vmatprep.subr.bf16.mxu1 %v4663_v15  ;;  %v443_v55 = vld [vmem:[#allocation7 + $0x78] sm:$0xff]  ;;  %v5216_v15 = vpack.c.bf16 %v4803_v19, %v4803_v19  ;;  %v4259_v19 = vcombine.high %v487_v42, %v491_v63 }
 0x18f   :  { %v4210_v30 = vcombine.low %v439_v54, %v443_v55 }
 0x190   :  { %3644 = vmatpush1.bf16.msra.mxu0 %v4660_v27  ;;  %v4211_v27 = vcombine.high %v439_v54, %v443_v55  ;;  %v4256_v54 = vcombine.low %v486_v1, %v490_v36  ;;  %v4258_v55 = vcombine.low %v487_v42, %v491_v63  ;;  %v547_v42 = vld [vmem:[#allocation7 + $0x3b8] sm:$0xff] }
 0x191   :  { %3808 = vmatpush1.bf16.msra.mxu1 %v4662_v28  ;;  %3645 = vmatprep.subr.bf16.mxu0 %v4669_v29  ;;  %v447_v28 = vld [vmem:[#allocation7 + $0x98] sm:$0xff] }
 0x192   :  { %3809 = vmatprep.subr.bf16.mxu1 %v4671_v48  ;;  %v451_v29 = vld [vmem:[#allocation7 + $0xb8] sm:$0xff]  ;;  %v4208_v48 = vcombine.low %v438_v22, %v442_v9  ;;  %v498_v22 = vld [vmem:[#allocation7 + $0x230] sm:$0xff] }
 0x193   :  { %v4219_v47 = vcombine.high %v447_v28, %v451_v29  ;;  %v495_v9 = vld [vmem:[#allocation7 + $0x218] sm:$0xff] }
 0x194   :  { %3646 = vmatpush1.bf16.msra.mxu0 %v4668_v45  ;;  %v458_v45 = vld [vmem:[#allocation7 + $0xf0] sm:$0xff] }
 0x195   :  { %3810 = vmatpush1.bf16.msra.mxu1 %v4670_v37  ;;  %3647 = vmatprep.subr.bf16.mxu0 %v4677_v41  ;;  %v459_v37 = vld [vmem:[#allocation7 + $0xf8] sm:$0xff]  ;;  %v4216_v41 = vcombine.low %v446_v24, %v450_v26  ;;  %v4225_v60 = vcombine.high %v454_v32, %v458_v45  ;;  %v502_v24 = vld [vmem:[#allocation7 + $0x250] sm:$0xff] }
 0x196   :  { %3811 = vmatprep.subr.bf16.mxu1 %v4679_v44  ;;  %v4218_v44 = vcombine.low %v447_v28, %v451_v29  ;;  %v4227_v46 = vcombine.high %v455_v33, %v459_v37  ;;  %v506_v26 = vld [vmem:[#allocation7 + $0x270] sm:$0xff]  ;;  %v507_v28 = vld [vmem:[#allocation7 + $0x278] sm:$0xff] }
 0x198   :  { %3648 = vmatpush1.bf16.msra.mxu0 %v4676_v2  ;;  %v463_v2 = vld [vmem:[#allocation7 + $0x118] sm:$0xff] }
 0x199   :  { %3812 = vmatpush1.bf16.msra.mxu1 %v4678_v6  ;;  %3649 = vmatprep.subr.bf16.mxu0 %v4685_v7  ;;  %v4226_v6 = vcombine.low %v455_v33, %v459_v37  ;;  %v4233_v7 = vcombine.high %v462_v25, %v466_v62  ;;  %v515_v33 = vld [vmem:[#allocation7 + $0x2b8] sm:$0xff]  ;;  %v4272_v37 = vcombine.low %v502_v24, %v506_v26 }
 0x19a   :  { %3813 = vmatprep.subr.bf16.mxu1 %v4687_v8  ;;  %v4235_v8 = vcombine.high %v463_v2, %v467_v3 }
 0x19c   :  { %3650 = vmatpush1.bf16.msra.mxu0 %v4684_v50  ;;  %v4232_v50 = vcombine.low %v462_v25, %v466_v62  ;;  %v522_v25 = vld [vmem:[#allocation7 + $0x2f0] sm:$0xff]  ;;  %v519_v62 = vld [vmem:[#allocation7 + $0x2d8] sm:$0xff] }
 0x19d   :  { %3814 = vmatpush1.bf16.msra.mxu1 %v4686_v51  ;;  %3651 = vmatprep.subr.bf16.mxu0 %v4693_v12  ;;  %v4234_v51 = vcombine.low %v463_v2, %v467_v3  ;;  %v4241_v12 = vcombine.high %v470_v4, %v474_v52  ;;  %v523_v2 = vld [vmem:[#allocation7 + $0x2f8] sm:$0xff] }
 0x19e   :  { %3815 = vmatprep.subr.bf16.mxu1 %v4695_v35  ;;  %v4243_v35 = vcombine.high %v471_v10, %v475_v11 }
 0x1a0   :  { %3652 = vmatpush1.bf16.msra.mxu0 %v4692_v5  ;;  %v4240_v5 = vcombine.low %v470_v4, %v474_v52  ;;  %v530_v4 = vld [vmem:[#allocation7 + $0x330] sm:$0xff]  ;;  %v527_v52 = vld [vmem:[#allocation7 + $0x318] sm:$0xff] }
 0x1a1   :  { %3816 = vmatpush1.bf16.msra.mxu1 %v4694_v34  ;;  %3653 = vmatprep.subr.bf16.mxu0 %v4701_v38  ;;  %v4242_v34 = vcombine.low %v471_v10, %v475_v11  ;;  %v4249_v38 = vcombine.high %v478_v58, %v482_v13  ;;  %v531_v10 = vld [vmem:[#allocation7 + $0x338] sm:$0xff] }
 0x1a2   :  { %3817 = vmatprep.subr.bf16.mxu1 %v4703_v39  ;;  %v4251_v39 = vcombine.high %v479_v14, %v483_v57 }
 0x1a4   :  { %3654 = vmatpush1.bf16.msra.mxu0 %v4700_v16  ;;  %v4248_v16 = vcombine.low %v478_v58, %v482_v13  ;;  %v538_v58 = vld [vmem:[#allocation7 + $0x370] sm:$0xff]  ;;  %v535_v13 = vld [vmem:[#allocation7 + $0x358] sm:$0xff] }
 0x1a5   :  { %3818 = vmatpush1.bf16.msra.mxu1 %v4702_v17  ;;  %3828 = vmatprep.subr.bf16.mxu0 %v4201_v18  ;;  %v4250_v17 = vcombine.low %v479_v14, %v483_v57  ;;  %v4257_v18 = vcombine.high %v486_v1, %v490_v36  ;;  %v539_v14 = vld [vmem:[#allocation7 + $0x378] sm:$0xff]  ;;  %v546_v1 = vld [vmem:[#allocation7 + $0x3b0] sm:$0xff] }
 0x1a6   :  { %3992 = vmatprep.subr.bf16.mxu1 %v4203_v21  ;;  %v494_v21 = vld [vmem:[#allocation7 + $0x210] sm:$0xff]  ;;  %v543_v36 = vld [vmem:[#allocation7 + $0x398] sm:$0xff] }
 0x1a7   :  { %3656 = vmatmul.mubr.bf16.vlgmr.msra.gmra.mrb[0].mxu0 %v5216_v15  ;;  %v4264_v29 = vcombine.low %v494_v21, %v498_v22 }
 0x1a8   :  { %3820 = vmatmul.mubr.bf16.vlgmr.msra.gmra.mrb[0].mxu1 %v5216_v15  ;;  %3829 = vmatpush1.bf16.msra.mxu0 %v4200_v23  ;;  %v499_v23 = vld [vmem:[#allocation7 + $0x238] sm:$0xff] }
 0x1a9   :  { %3860 = vmatprep.mubr.bf16.mxu0 %v5177_v53  ;;  %3993 = vmatpush1.bf16.msra.mxu1 %v4202_v56  ;;  %v4265_v56 = vcombine.high %v494_v21, %v498_v22  ;;  %v554_v21 = vld [vmem:[#allocation7 + $0x3f0] sm:$0xff]  ;;  %v551_v22 = vld [vmem:[#allocation7 + $0x3d8] sm:$0xff] }
 0x1aa   :  { %4024 = vmatprep.mubr.bf16.mxu1 %v5177_v53  ;;  %3830 = vmatprep.subr.bf16.mxu0 %v4209_v59  ;;  %v4224_v53 = vcombine.low %v454_v32, %v458_v45  ;;  %v4267_v59 = vcombine.high %v495_v9, %v499_v23  ;;  %v514_v32 = vld [vmem:[#allocation7 + $0x2b0] sm:$0xff]  ;;  %v511_v45 = vld [vmem:[#allocation7 + $0x298] sm:$0xff] }
 0x1ab   :  { %3994 = vmatprep.subr.bf16.mxu1 %v4211_v27  ;;  %v503_v27 = vld [vmem:[#allocation7 + $0x258] sm:$0xff] }
 0x1ac   :  { %3831 = vmatpush1.bf16.msra.mxu0 %v4208_v48  ;;  %v4266_v48 = vcombine.low %v495_v9, %v499_v23  ;;  %v555_v9 = vld [vmem:[#allocation7 + $0x3f8] sm:$0xff] }
 0x1ad   :  { %3995 = vmatpush1.bf16.msra.mxu1 %v4210_v30  ;;  %3832 = vmatprep.subr.bf16.mxu0 %v4217_v31  ;;  %v4273_v30 = vcombine.high %v502_v24, %v506_v26  ;;  %v4275_v31 = vcombine.high %v503_v27, %v507_v28  ;;  %v562_v24 = vld [vmem:[#allocation7 + $0x430] sm:$0xff]  ;;  %v559_v26 = vld [vmem:[#allocation7 + $0x418] sm:$0xff] }
 0x1ae   :  { %3996 = vmatprep.subr.bf16.mxu1 %v4219_v47  ;;  %v510_v47 = vld [vmem:[#allocation7 + $0x290] sm:$0xff] }
 0x1af   :  { %v4280_v3 = vcombine.low %v510_v47, %v514_v32 }
 0x1b0   :  { %3833 = vmatpush1.bf16.msra.mxu0 %v4216_v41  ;;  %v4274_v41 = vcombine.low %v503_v27, %v507_v28  ;;  %v563_v27 = vld [vmem:[#allocation7 + $0x438] sm:$0xff] }
 0x1b1   :  { %3997 = vmatpush1.bf16.msra.mxu1 %v4218_v44  ;;  %3834 = vmatprep.subr.bf16.mxu0 %v4225_v60  ;;  %v4281_v44 = vcombine.high %v510_v47, %v514_v32  ;;  %v4283_v60 = vcombine.high %v511_v45, %v515_v33  ;;  %v570_v47 = vld [vmem:[#allocation7 + $0x470] sm:$0xff] }
 0x1b2   :  { %3998 = vmatprep.subr.bf16.mxu1 %v4227_v46  ;;  %v518_v46 = vld [vmem:[#allocation7 + $0x2d0] sm:$0xff] }
 0x1b3   :  { %v4288_v11 = vcombine.low %v518_v46, %v522_v25 }
 0x1b4   :  { %3835 = vmatpush1.bf16.msra.mxu0 %v4224_v53  ;;  %v4282_v53 = vcombine.low %v511_v45, %v515_v33  ;;  %v567_v45 = vld [vmem:[#allocation7 + $0x458] sm:$0xff] }
 0x1b5   :  { %3999 = vmatpush1.bf16.msra.mxu1 %v4226_v6  ;;  %3836 = vmatprep.subr.bf16.mxu0 %v4233_v7  ;;  %v4289_v6 = vcombine.high %v518_v46, %v522_v25  ;;  %v4291_v7 = vcombine.high %v519_v62, %v523_v2  ;;  %v571_v33 = vld [vmem:[#allocation7 + $0x478] sm:$0xff] }
 0x1b6   :  { %4000 = vmatprep.subr.bf16.mxu1 %v4235_v8  ;;  %v526_v8 = vld [vmem:[#allocation7 + $0x310] sm:$0xff]  ;;  %v4339_v46 = vcombine.high %v567_v45, %v571_v33  ;;  %v575_v25 = vld [vmem:[#allocation7 + $0x498] sm:$0xff] }
 0x1b7   :  { %v4296_v57 = vcombine.low %v526_v8, %v530_v4 }
 0x1b8   :  { %3837 = vmatpush1.bf16.msra.mxu0 %v4232_v50  ;;  %v4290_v50 = vcombine.low %v519_v62, %v523_v2  ;;  %v579_v62 = vld [vmem:[#allocation7 + $0x4b8] sm:$0xff] }
 0x1b9   :  { %4001 = vmatpush1.bf16.msra.mxu1 %v4234_v51  ;;  %3838 = vmatprep.subr.bf16.mxu0 %v4241_v12  ;;  %v4297_v51 = vcombine.high %v526_v8, %v530_v4  ;;  %v4299_v12 = vcombine.high %v527_v52, %v531_v10  ;;  %v586_v8 = vld [vmem:[#allocation7 + $0x4f0] sm:$0xff]  ;;  %v583_v4 = vld [vmem:[#allocation7 + $0x4d8] sm:$0xff] }
 0x1ba   :  { %4002 = vmatprep.subr.bf16.mxu1 %v4243_v35  ;;  %v534_v35 = vld [vmem:[#allocation7 + $0x350] sm:$0xff] }
 0x1bb   :  { %v4304_v63 = vcombine.low %v534_v35, %v538_v58 }
 0x1bc   :  { %3839 = vmatpush1.bf16.msra.mxu0 %v4240_v5  ;;  %v4298_v5 = vcombine.low %v527_v52, %v531_v10  ;;  %v587_v52 = vld [vmem:[#allocation7 + $0x4f8] sm:$0xff] }
 0x1bd   :  { %4003 = vmatpush1.bf16.msra.mxu1 %v4242_v34  ;;  %3840 = vmatprep.subr.bf16.mxu0 %v4249_v38  ;;  %v4305_v34 = vcombine.high %v534_v35, %v538_v58  ;;  %v4307_v38 = vcombine.high %v535_v13, %v539_v14  ;;  %v591_v35 = vld [vmem:[#allocation7 + $0x518] sm:$0xff] }
 0x1be   :  { %4004 = vmatprep.subr.bf16.mxu1 %v4251_v39  ;;  %v542_v39 = vld [vmem:[#allocation7 + $0x390] sm:$0xff]  ;;  %v595_v58 = vld [vmem:[#allocation7 + $0x538] sm:$0xff] }
 0x1bf   :  { %v4312_v23 = vcombine.low %v542_v39, %v546_v1 }
 0x1c0   :  { %3841 = vmatpush1.bf16.msra.mxu0 %v4248_v16  ;;  %v4306_v16 = vcombine.low %v535_v13, %v539_v14  ;;  %v4354_v13 = vcombine.low %v583_v4, %v587_v52 }
 0x1c1   :  { %4005 = vmatpush1.bf16.msra.mxu1 %v4250_v17  ;;  %3842 = vmatprep.subr.bf16.mxu0 %v4257_v18  ;;  %v4313_v17 = vcombine.high %v542_v39, %v546_v1  ;;  %v4315_v18 = vcombine.high %v543_v36, %v547_v42  ;;  %v603_v39 = vld [vmem:[#allocation7 + $0x578] sm:$0xff] }
 0x1c2   :  { %4006 = vmatprep.subr.bf16.mxu1 %v4259_v19  ;;  %v550_v19 = vld [vmem:[#allocation7 + $0x3d0] sm:$0xff] }
 0x1c3   :  { %v4320_v28 = vcombine.low %v550_v19, %v554_v21 }
 0x1c4   :  { %3843 = vmatpush1.bf16.msra.mxu0 %v4256_v54  ;;  %v4314_v54 = vcombine.low %v543_v36, %v547_v42  ;;  %v4362_v36 = vcombine.low %v591_v35, %v595_v58 }
 0x1c5   :  { %4007 = vmatpush1.bf16.msra.mxu1 %v4258_v55  ;;  %3844 = vmatprep.subr.bf16.mxu0 %v4265_v56  ;;  %v4321_v55 = vcombine.high %v550_v19, %v554_v21  ;;  %v4323_v56 = vcombine.high %v551_v22, %v555_v9  ;;  %v611_v19 = vld [vmem:[#allocation7 + $0x5b8] sm:$0xff] }
 0x1c6   :  { %4008 = vmatprep.subr.bf16.mxu1 %v4267_v59  ;;  %v558_v59 = vld [vmem:[#allocation7 + $0x410] sm:$0xff] }
 0x1c7   :  { %v4328_v32 = vcombine.low %v558_v59, %v562_v24 }
 0x1c8   :  { %3845 = vmatpush1.bf16.msra.mxu0 %v4264_v29  ;;  %v4322_v29 = vcombine.low %v551_v22, %v555_v9 }
 0x1c9   :  { %4009 = vmatpush1.bf16.msra.mxu1 %v4266_v48  ;;  %3846 = vmatprep.subr.bf16.mxu0 %v4273_v30  ;;  %v4329_v48 = vcombine.high %v558_v59, %v562_v24  ;;  %v4331_v30 = vcombine.high %v559_v26, %v563_v27  ;;  %v619_v59 = vld [vmem:[#allocation7 + $0x5f8] sm:$0xff] }
 0x1ca   :  { %4010 = vmatprep.subr.bf16.mxu1 %v4275_v31  ;;  %v566_v31 = vld [vmem:[#allocation7 + $0x450] sm:$0xff] }
 0x1cb   :  { %v4336_v2 = vcombine.low %v566_v31, %v570_v47 }
 0x1cc   :  { %3847 = vmatpush1.bf16.msra.mxu0 %v4272_v37  ;;  %v4330_v37 = vcombine.low %v559_v26, %v563_v27 }
 0x1cd   :  { %4011 = vmatpush1.bf16.msra.mxu1 %v4274_v41  ;;  %3848 = vmatprep.subr.bf16.mxu0 %v4281_v44  ;;  %v4337_v41 = vcombine.high %v566_v31, %v570_v47  ;;  %v574_v44 = vld [vmem:[#allocation7 + $0x490] sm:$0xff]  ;;  %v627_v31 = vld [vmem:[#allocation7 + $0x638] sm:$0xff] }
 0x1ce   :  { %4012 = vmatprep.subr.bf16.mxu1 %v4283_v60  ;;  %v578_v60 = vld [vmem:[#allocation7 + $0x4b0] sm:$0xff] }
 0x1cf   :  { %v4344_v10 = vcombine.low %v574_v44, %v578_v60 }
 0x1d0   :  { %3849 = vmatpush1.bf16.msra.mxu0 %v4280_v3  ;;  %v4338_v3 = vcombine.low %v567_v45, %v571_v33 }
 0x1d1   :  { %4013 = vmatpush1.bf16.msra.mxu1 %v4282_v53  ;;  %3850 = vmatprep.subr.bf16.mxu0 %v4289_v6  ;;  %v4345_v53 = vcombine.high %v574_v44, %v578_v60  ;;  %v4347_v6 = vcombine.high %v575_v25, %v579_v62  ;;  %v631_v44 = vld [vmem:[#allocation7 + $0x658] sm:$0xff] }
 0x1d2   :  { %4014 = vmatprep.subr.bf16.mxu1 %v4291_v7  ;;  %v582_v7 = vld [vmem:[#allocation7 + $0x4d0] sm:$0xff]  ;;  %v635_v60 = vld [vmem:[#allocation7 + $0x678] sm:$0xff] }
 0x1d4   :  { %3851 = vmatpush1.bf16.msra.mxu0 %v4288_v11  ;;  %v4353_v11 = vcombine.high %v582_v7, %v586_v8 }
 0x1d5   :  { %4015 = vmatpush1.bf16.msra.mxu1 %v4290_v50  ;;  %3852 = vmatprep.subr.bf16.mxu0 %v4297_v51  ;;  %v4355_v50 = vcombine.high %v583_v4, %v587_v52  ;;  %v590_v51 = vld [vmem:[#allocation7 + $0x510] sm:$0xff]  ;;  %v4402_v4 = vcombine.low %v631_v44, %v635_v60 }
 0x1d6   :  { %4016 = vmatprep.subr.bf16.mxu1 %v4299_v12  ;;  %v594_v12 = vld [vmem:[#allocation7 + $0x530] sm:$0xff] }
 0x1d7   :  { %v4361_v14 = vcombine.high %v590_v51, %v594_v12  ;;  %v4360_v1 = vcombine.low %v590_v51, %v594_v12  ;;  %v651_v51 = vld [vmem:[#allocation7 + $0x6f8] sm:$0xff] }
 0x1d8   :  { %3853 = vmatpush1.bf16.msra.mxu0 %v4296_v57  ;;  %v4363_v57 = vcombine.high %v591_v35, %v595_v58 }
 0x1d9   :  { %4017 = vmatpush1.bf16.msra.mxu1 %v4298_v5  ;;  %3854 = vmatprep.subr.bf16.mxu0 %v4305_v34  ;;  %v598_v5 = vld [vmem:[#allocation7 + $0x550] sm:$0xff] }
 0x1da   :  { %4018 = vmatprep.subr.bf16.mxu1 %v4307_v38  ;;  %v602_v34 = vld [vmem:[#allocation7 + $0x570] sm:$0xff]  ;;  %v599_v38 = vld [vmem:[#allocation7 + $0x558] sm:$0xff] }
 0x1db   :  { %v4369_v42 = vcombine.high %v598_v5, %v602_v34  ;;  %v4368_v21 = vcombine.low %v598_v5, %v602_v34  ;;  %v4370_v22 = vcombine.low %v599_v38, %v603_v39  ;;  %v659_v5 = vld [vmem:[#allocation7 + $0x738] sm:$0xff] }
 0x1dc   :  { %3855 = vmatpush1.bf16.msra.mxu0 %v4304_v63  ;;  %v4371_v63 = vcombine.high %v599_v38, %v603_v39 }
 0x1dd   :  { %4019 = vmatpush1.bf16.msra.mxu1 %v4306_v16  ;;  %3856 = vmatprep.subr.bf16.mxu0 %v4313_v17  ;;  %v606_v16 = vld [vmem:[#allocation7 + $0x590] sm:$0xff] }
 0x1de   :  { %4020 = vmatprep.subr.bf16.mxu1 %v4315_v18  ;;  %v610_v17 = vld [vmem:[#allocation7 + $0x5b0] sm:$0xff]  ;;  %v607_v18 = vld [vmem:[#allocation7 + $0x598] sm:$0xff] }
 0x1df   :  { %v4377_v9 = vcombine.high %v606_v16, %v610_v17  ;;  %v4376_v24 = vcombine.low %v606_v16, %v610_v17  ;;  %v4378_v26 = vcombine.low %v607_v18, %v611_v19  ;;  %v667_v16 = vld [vmem:[#allocation7 + $0x778] sm:$0xff] }
 0x1e0   :  { %3857 = vmatpush1.bf16.msra.mxu0 %v4312_v23  ;;  %v4379_v23 = vcombine.high %v607_v18, %v611_v19 }
 0x1e1   :  { %4021 = vmatpush1.bf16.msra.mxu1 %v4314_v54  ;;  %3858 = vmatprep.subr.bf16.mxu0 %v4321_v55  ;;  %v614_v54 = vld [vmem:[#allocation7 + $0x5d0] sm:$0xff] }
 0x1e2   :  { %4022 = vmatprep.subr.bf16.mxu1 %v4323_v56  ;;  %v618_v55 = vld [vmem:[#allocation7 + $0x5f0] sm:$0xff]  ;;  %v615_v56 = vld [vmem:[#allocation7 + $0x5d8] sm:$0xff] }
 0x1e3   :  { %v4385_v27 = vcombine.high %v614_v54, %v618_v55  ;;  %v4384_v47 = vcombine.low %v614_v54, %v618_v55  ;;  %v675_v54 = vld [vmem:[#allocation7 + $0x7b8] sm:$0xff] }
 0x1e4   :  { %3859 = vmatpush1.bf16.msra.mxu0 %v4320_v28  ;;  %v4387_v28 = vcombine.high %v615_v56, %v619_v59 }
 0x1e5   :  { %4023 = vmatpush1.bf16.msra.mxu1 %v4322_v29  ;;  %3869 = vmatprep.subr.bf16.mxu0 %v4329_v48  ;;  %v622_v29 = vld [vmem:[#allocation7 + $0x610] sm:$0xff] }
 0x1e6   :  { %4033 = vmatprep.subr.bf16.mxu1 %v4331_v30  ;;  %v626_v48 = vld [vmem:[#allocation7 + $0x630] sm:$0xff]  ;;  %v623_v30 = vld [vmem:[#allocation7 + $0x618] sm:$0xff] }
 0x1e7   :  { %3861 = vmatmul.mubr.bf16.vlgmr.msra.gmra.mrb[4].mxu0 %v5179_v0  ;;  %v4393_v45 = vcombine.high %v622_v29, %v626_v48  ;;  %v4395_v33 = vcombine.high %v623_v30, %v627_v31 }
 0x1e8   :  { %4025 = vmatmul.mubr.bf16.vlgmr.msra.gmra.mrb[4].mxu1 %v5179_v0  ;;  %3870 = vmatpush1.bf16.msra.mxu0 %v4328_v32  ;;  %v4346_v0 = vcombine.low %v575_v25, %v579_v62  ;;  %v4386_v32 = vcombine.low %v615_v56, %v619_v59  ;;  %v4394_v25 = vcombine.low %v623_v30, %v627_v31 }
 0x1e9   :  { %3901 = vmatprep.mubr.bf16.mxu0 %v5185_v20  ;;  %4034 = vmatpush1.bf16.msra.mxu1 %v4330_v37  ;;  %v630_v37 = vld [vmem:[#allocation7 + $0x650] sm:$0xff] }
 0x1ea   :  { %4065 = vmatprep.mubr.bf16.mxu1 %v5185_v20  ;;  %3871 = vmatprep.subr.bf16.mxu0 %v4337_v41  ;;  %v4352_v20 = vcombine.low %v582_v7, %v586_v8  ;;  %v634_v41 = vld [vmem:[#allocation7 + $0x670] sm:$0xff]  ;;  %v643_v7 = vld [vmem:[#allocation7 + $0x6b8] sm:$0xff] }
 0x1eb   :  { %4035 = vmatprep.subr.bf16.mxu1 %v4339_v46  ;;  %v4392_v46 = vcombine.low %v622_v29, %v626_v48  ;;  %v4401_v62 = vcombine.high %v630_v37, %v634_v41  ;;  %v4400_v8 = vcombine.low %v630_v37, %v634_v41  ;;  %v683_v29 = vld [vmem:[#allocation7 + $0x7f8] sm:$0xff] }
 0x1ec   :  { %3872 = vmatpush1.bf16.msra.mxu0 %v4336_v2  ;;  %v4403_v2 = vcombine.high %v631_v44, %v635_v60  ;;  %v691_v37 = vld [vmem:[#allocation7 + $0x838] sm:$0xff] }
 0x1ed   :  { %4036 = vmatpush1.bf16.msra.mxu1 %v4338_v3  ;;  %3873 = vmatprep.subr.bf16.mxu0 %v4345_v53  ;;  %v638_v3 = vld [vmem:[#allocation7 + $0x690] sm:$0xff] }
 0x1ee   :  { %4037 = vmatprep.subr.bf16.mxu1 %v4347_v6  ;;  %v642_v53 = vld [vmem:[#allocation7 + $0x6b0] sm:$0xff]  ;;  %v639_v6 = vld [vmem:[#allocation7 + $0x698] sm:$0xff] }
 0x1ef   :  { %v4409_v52 = vcombine.high %v638_v3, %v642_v53  ;;  %v4408_v12 = vcombine.low %v638_v3, %v642_v53  ;;  %v4410_v35 = vcombine.low %v639_v6, %v643_v7  ;;  %v695_v3 = vld [vmem:[#allocation7 + $0x858] sm:$0xff] }
 0x1f0   :  { %3874 = vmatpush1.bf16.msra.mxu0 %v4344_v10  ;;  %v4411_v10 = vcombine.high %v639_v6, %v643_v7  ;;  %v699_v53 = vld [vmem:[#allocation7 + $0x878] sm:$0xff] }
 0x1f1   :  { %4038 = vmatpush1.bf16.msra.mxu1 %v4346_v0  ;;  %3875 = vmatprep.subr.bf16.mxu0 %v4353_v11  ;;  %v646_v0 = vld [vmem:[#allocation7 + $0x6d0] sm:$0xff] }
 0x1f2   :  { %4039 = vmatprep.subr.bf16.mxu1 %v4355_v50  ;;  %v650_v11 = vld [vmem:[#allocation7 + $0x6f0] sm:$0xff]  ;;  %v647_v50 = vld [vmem:[#allocation7 + $0x6d8] sm:$0xff] }
 0x1f3   :  { %v4417_v58 = vcombine.high %v646_v0, %v650_v11  ;;  %v4416_v34 = vcombine.low %v646_v0, %v650_v11  ;;  %v4418_v38 = vcombine.low %v647_v50, %v651_v51  ;;  %v707_v0 = vld [vmem:[#allocation7 + $0x8b8] sm:$0xff] }
 0x1f4   :  { %3876 = vmatpush1.bf16.msra.mxu0 %v4352_v20  ;;  %v4419_v20 = vcombine.high %v647_v50, %v651_v51  ;;  %v4466_v50 = vcombine.low %v695_v3, %v699_v53 }
 0x1f5   :  { %4040 = vmatpush1.bf16.msra.mxu1 %v4354_v13  ;;  %3877 = vmatprep.subr.bf16.mxu0 %v4361_v14  ;;  %v654_v13 = vld [vmem:[#allocation7 + $0x710] sm:$0xff] }
 0x1f6   :  { %4041 = vmatprep.subr.bf16.mxu1 %v4363_v57  ;;  %v658_v14 = vld [vmem:[#allocation7 + $0x730] sm:$0xff]  ;;  %v655_v57 = vld [vmem:[#allocation7 + $0x718] sm:$0xff] }
 0x1f7   :  { %v4425_v39 = vcombine.high %v654_v13, %v658_v14  ;;  %v4424_v17 = vcombine.low %v654_v13, %v658_v14  ;;  %v4426_v18 = vcombine.low %v655_v57, %v659_v5  ;;  %v715_v13 = vld [vmem:[#allocation7 + $0x8f8] sm:$0xff] }
 0x1f8   :  { %3878 = vmatpush1.bf16.msra.mxu0 %v4360_v1  ;;  %v4427_v1 = vcombine.high %v655_v57, %v659_v5 }
 0x1f9   :  { %4042 = vmatpush1.bf16.msra.mxu1 %v4362_v36  ;;  %3879 = vmatprep.subr.bf16.mxu0 %v4369_v42  ;;  %v662_v36 = vld [vmem:[#allocation7 + $0x750] sm:$0xff] }
 0x1fa   :  { %4043 = vmatprep.subr.bf16.mxu1 %v4371_v63  ;;  %v666_v42 = vld [vmem:[#allocation7 + $0x770] sm:$0xff]  ;;  %v663_v63 = vld [vmem:[#allocation7 + $0x758] sm:$0xff] }
 0x1fb   :  { %v4433_v19 = vcombine.high %v662_v36, %v666_v42  ;;  %v4432_v55 = vcombine.low %v662_v36, %v666_v42  ;;  %v4434_v56 = vcombine.low %v663_v63, %v667_v16 }
 0x1fc   :  { %3880 = vmatpush1.bf16.msra.mxu0 %v4368_v21  ;;  %v4435_v21 = vcombine.high %v663_v63, %v667_v16  ;;  %v726_v16 = vld [vmem:[#allocation7 + $0x950] sm:$0xff] }
 0x1fd   :  { %4044 = vmatpush1.bf16.msra.mxu1 %v4370_v22  ;;  %3881 = vmatprep.subr.bf16.mxu0 %v4377_v9  ;;  %v670_v22 = vld [vmem:[#allocation7 + $0x790] sm:$0xff] }
 0x1fe   :  { %4045 = vmatprep.subr.bf16.mxu1 %v4379_v23  ;;  %v674_v9 = vld [vmem:[#allocation7 + $0x7b0] sm:$0xff]  ;;  %v671_v23 = vld [vmem:[#allocation7 + $0x798] sm:$0xff] }
 0x1ff   :  { %v4441_v59 = vcombine.high %v670_v22, %v674_v9  ;;  %v4440_v48 = vcombine.low %v670_v22, %v674_v9  ;;  %v4442_v30 = vcombine.low %v671_v23, %v675_v54 }
 0x200   :  { %3882 = vmatpush1.bf16.msra.mxu0 %v4376_v24  ;;  %v4443_v24 = vcombine.high %v671_v23, %v675_v54  ;;  %v734_v54 = vld [vmem:[#allocation7 + $0x990] sm:$0xff] }
 0x201   :  { %4046 = vmatpush1.bf16.msra.mxu1 %v4378_v26  ;;  %3883 = vmatprep.subr.bf16.mxu0 %v4385_v27  ;;  %v678_v26 = vld [vmem:[#allocation7 + $0x7d0] sm:$0xff] }
 0x202   :  { %4047 = vmatprep.subr.bf16.mxu1 %v4387_v28  ;;  %v682_v27 = vld [vmem:[#allocation7 + $0x7f0] sm:$0xff]  ;;  %v679_v28 = vld [vmem:[#allocation7 + $0x7d8] sm:$0xff] }
 0x203   :  { %v4449_v31 = vcombine.high %v678_v26, %v682_v27  ;;  %v4448_v41 = vcombine.low %v678_v26, %v682_v27  ;;  %v4450_v44 = vcombine.low %v679_v28, %v683_v29 }
 0x204   :  { %3884 = vmatpush1.bf16.msra.mxu0 %v4384_v47  ;;  %v4451_v47 = vcombine.high %v679_v28, %v683_v29  ;;  %v742_v29 = vld [vmem:[#allocation7 + $0x9d0] sm:$0xff] }
 0x205   :  { %4048 = vmatpush1.bf16.msra.mxu1 %v4386_v32  ;;  %3885 = vmatprep.subr.bf16.mxu0 %v4393_v45  ;;  %v686_v32 = vld [vmem:[#allocation7 + $0x810] sm:$0xff] }
 0x206   :  { %4049 = vmatprep.subr.bf16.mxu1 %v4395_v33  ;;  %v690_v45 = vld [vmem:[#allocation7 + $0x830] sm:$0xff]  ;;  %v687_v33 = vld [vmem:[#allocation7 + $0x818] sm:$0xff] }
 0x207   :  { %v4457_v60 = vcombine.high %v686_v32, %v690_v45  ;;  %v4458_v6 = vcombine.low %v687_v33, %v691_v37 }
 0x208   :  { %3886 = vmatpush1.bf16.msra.mxu0 %v4392_v46  ;;  %v4459_v46 = vcombine.high %v687_v33, %v691_v37  ;;  %v750_v37 = vld [vmem:[#allocation7 + $0xa10] sm:$0xff] }
 0x209   :  { %4050 = vmatpush1.bf16.msra.mxu1 %v4394_v25  ;;  %3887 = vmatprep.subr.bf16.mxu0 %v4401_v62  ;;  %v694_v25 = vld [vmem:[#allocation7 + $0x850] sm:$0xff] }
 0x20a   :  { %4051 = vmatprep.subr.bf16.mxu1 %v4403_v2  ;;  %v698_v62 = vld [vmem:[#allocation7 + $0x870] sm:$0xff]  ;;  %v4456_v2 = vcombine.low %v686_v32, %v690_v45 }
 0x20b   :  { %v4465_v7 = vcombine.high %v694_v25, %v698_v62  ;;  %v4464_v11 = vcombine.low %v694_v25, %v698_v62 }
 0x20c   :  { %3888 = vmatpush1.bf16.msra.mxu0 %v4400_v8  ;;  %v702_v8 = vld [vmem:[#allocation7 + $0x890] sm:$0xff] }
 0x20d   :  { %4052 = vmatpush1.bf16.msra.mxu1 %v4402_v4  ;;  %3889 = vmatprep.subr.bf16.mxu0 %v4409_v52  ;;  %v706_v4 = vld [vmem:[#allocation7 + $0x8b0] sm:$0xff]  ;;  %v4467_v52 = vcombine.high %v695_v3, %v699_v53 }
 0x20e   :  { %4053 = vmatprep.subr.bf16.mxu1 %v4411_v10  ;;  %v703_v10 = vld [vmem:[#allocation7 + $0x898] sm:$0xff]  ;;  %v4473_v51 = vcombine.high %v702_v8, %v706_v4  ;;  %v4472_v14 = vcombine.low %v702_v8, %v706_v4  ;;  %v758_v3 = vld [vmem:[#allocation7 + $0xa50] sm:$0xff] }
 0x20f   :  { %v762_v53 = vld [vmem:[#allocation7 + $0xa70] sm:$0xff] }
 0x210   :  { %3890 = vmatpush1.bf16.msra.mxu0 %v4408_v12  ;;  %v4475_v12 = vcombine.high %v703_v10, %v707_v0 }
 0x211   :  { %4054 = vmatpush1.bf16.msra.mxu1 %v4410_v35  ;;  %3891 = vmatprep.subr.bf16.mxu0 %v4417_v58  ;;  %v710_v35 = vld [vmem:[#allocation7 + $0x8d0] sm:$0xff] }
 0x212   :  { %4055 = vmatprep.subr.bf16.mxu1 %v4419_v20  ;;  %v714_v58 = vld [vmem:[#allocation7 + $0x8f0] sm:$0xff]  ;;  %v711_v20 = vld [vmem:[#allocation7 + $0x8d8] sm:$0xff] }
 0x213   :  { %v4481_v57 = vcombine.high %v710_v35, %v714_v58  ;;  %v4483_v5 = vcombine.high %v711_v20, %v715_v13  ;;  %v4482_v36 = vcombine.low %v711_v20, %v715_v13  ;;  %v774_v13 = vld [vmem:[#allocation7 + $0xad0] sm:$0xff] }
 0x214   :  { %3892 = vmatpush1.bf16.msra.mxu0 %v4416_v34  ;;  %v718_v34 = vld [vmem:[#allocation7 + $0x910] sm:$0xff] }
 0x215   :  { %4056 = vmatpush1.bf16.msra.mxu1 %v4418_v38  ;;  %3893 = vmatprep.subr.bf16.mxu0 %v4425_v39  ;;  %v722_v38 = vld [vmem:[#allocation7 + $0x930] sm:$0xff]  ;;  %v719_v39 = vld [vmem:[#allocation7 + $0x918] sm:$0xff] }
 0x216   :  { %4057 = vmatprep.subr.bf16.mxu1 %v4427_v1  ;;  %v723_v1 = vld [vmem:[#allocation7 + $0x938] sm:$0xff]  ;;  %v4489_v42 = vcombine.high %v718_v34, %v722_v38 }
 0x217   :  { %v4491_v63 = vcombine.high %v719_v39, %v723_v1  ;;  %v4490_v22 = vcombine.low %v719_v39, %v723_v1  ;;  %v782_v1 = vld [vmem:[#allocation7 + $0xb10] sm:$0xff] }
 0x218   :  { %3894 = vmatpush1.bf16.msra.mxu0 %v4424_v17  ;;  %v730_v17 = vld [vmem:[#allocation7 + $0x970] sm:$0xff] }
 0x219   :  { %4058 = vmatpush1.bf16.msra.mxu1 %v4426_v18  ;;  %3895 = vmatprep.subr.bf16.mxu0 %v4433_v19  ;;  %v727_v18 = vld [vmem:[#allocation7 + $0x958] sm:$0xff]  ;;  %v4497_v9 = vcombine.high %v726_v16, %v730_v17 }
 0x21a   :  { %4059 = vmatprep.subr.bf16.mxu1 %v4435_v21  ;;  %v731_v19 = vld [vmem:[#allocation7 + $0x978] sm:$0xff]  ;;  %v4488_v21 = vcombine.low %v718_v34, %v722_v38 }
 0x21b   :  { %v4499_v23 = vcombine.high %v727_v18, %v731_v19  ;;  %v4498_v26 = vcombine.low %v727_v18, %v731_v19  ;;  %v790_v19 = vld [vmem:[#allocation7 + $0xb50] sm:$0xff] }
 0x21c   :  { %3896 = vmatpush1.bf16.msra.mxu0 %v4432_v55  ;;  %v738_v55 = vld [vmem:[#allocation7 + $0x9b0] sm:$0xff] }
 0x21d   :  { %4060 = vmatpush1.bf16.msra.mxu1 %v4434_v56  ;;  %3897 = vmatprep.subr.bf16.mxu0 %v4441_v59  ;;  %v735_v56 = vld [vmem:[#allocation7 + $0x998] sm:$0xff]  ;;  %v4505_v27 = vcombine.high %v734_v54, %v738_v55 }
 0x21e   :  { %4061 = vmatprep.subr.bf16.mxu1 %v4443_v24  ;;  %v739_v59 = vld [vmem:[#allocation7 + $0x9b8] sm:$0xff]  ;;  %v4496_v24 = vcombine.low %v726_v16, %v730_v17 }
 0x21f   :  { %v4507_v28 = vcombine.high %v735_v56, %v739_v59  ;;  %v4506_v32 = vcombine.low %v735_v56, %v739_v59  ;;  %v798_v59 = vld [vmem:[#allocation7 + $0xb90] sm:$0xff] }
 0x220   :  { %3898 = vmatpush1.bf16.msra.mxu0 %v4440_v48  ;;  %v746_v48 = vld [vmem:[#allocation7 + $0x9f0] sm:$0xff] }
 0x221   :  { %4062 = vmatpush1.bf16.msra.mxu1 %v4442_v30  ;;  %3899 = vmatprep.subr.bf16.mxu0 %v4449_v31  ;;  %v743_v30 = vld [vmem:[#allocation7 + $0x9d8] sm:$0xff]  ;;  %v4513_v45 = vcombine.high %v742_v29, %v746_v48 }
 0x222   :  { %4063 = vmatprep.subr.bf16.mxu1 %v4451_v47  ;;  %v747_v31 = vld [vmem:[#allocation7 + $0x9f8] sm:$0xff]  ;;  %v4504_v47 = vcombine.low %v734_v54, %v738_v55 }
 0x223   :  { %v4515_v33 = vcombine.high %v743_v30, %v747_v31  ;;  %v4514_v25 = vcombine.low %v743_v30, %v747_v31  ;;  %v806_v31 = vld [vmem:[#allocation7 + $0xbd0] sm:$0xff] }
 0x224   :  { %3900 = vmatpush1.bf16.msra.mxu0 %v4448_v41  ;;  %v754_v41 = vld [vmem:[#allocation7 + $0xa30] sm:$0xff] }
 0x225   :  { %4064 = vmatpush1.bf16.msra.mxu1 %v4450_v44  ;;  %3910 = vmatprep.subr.bf16.mxu0 %v4457_v60  ;;  %v751_v44 = vld [vmem:[#allocation7 + $0xa18] sm:$0xff]  ;;  %v4521_v62 = vcombine.high %v750_v37, %v754_v41  ;;  %v4520_v8 = vcombine.low %v750_v37, %v754_v41 }
 0x226   :  { %4074 = vmatprep.subr.bf16.mxu1 %v4459_v46  ;;  %v755_v60 = vld [vmem:[#allocation7 + $0xa38] sm:$0xff]  ;;  %v4512_v46 = vcombine.low %v742_v29, %v746_v48 }
 0x227   :  { %3902 = vmatmul.mubr.bf16.vlgmr.msra.gmra.mrb[4].mxu0 %v5197_v40  ;;  %v4522_v4 = vcombine.low %v751_v44, %v755_v60 }
 0x228   :  { %4066 = vmatmul.mubr.bf16.vlgmr.msra.gmra.mrb[4].mxu1 %v5197_v40  ;;  %3911 = vmatpush1.bf16.msra.mxu0 %v4456_v2  ;;  %v4474_v40 = vcombine.low %v703_v10, %v707_v0  ;;  %v4523_v2 = vcombine.high %v751_v44, %v755_v60  ;;  %v766_v0 = vld [vmem:[#allocation7 + $0xa90] sm:$0xff] }
 0x229   :  { %3942 = vmatprep.mubr.bf16.mxu0 %v5199_v49  ;;  %4075 = vmatpush1.bf16.msra.mxu1 %v4458_v6  ;;  %v759_v6 = vld [vmem:[#allocation7 + $0xa58] sm:$0xff]  ;;  %v814_v60 = vld [vmem:[#allocation7 + $0xc10] sm:$0xff] }
 0x22a   :  { %4106 = vmatprep.mubr.bf16.mxu1 %v5199_v49  ;;  %3912 = vmatprep.subr.bf16.mxu0 %v4465_v7  ;;  %v4480_v49 = vcombine.low %v710_v35, %v714_v58  ;;  %v763_v7 = vld [vmem:[#allocation7 + $0xa78] sm:$0xff] }
 0x22b   :  { %4076 = vmatprep.subr.bf16.mxu1 %v4467_v52  ;;  %v4529_v52 = vcombine.high %v758_v3, %v762_v53  ;;  %v4531_v10 = vcombine.high %v759_v6, %v763_v7  ;;  %v4530_v35 = vcombine.low %v759_v6, %v763_v7  ;;  %v822_v7 = vld [vmem:[#allocation7 + $0xc50] sm:$0xff] }
 0x22c   :  { %3913 = vmatpush1.bf16.msra.mxu0 %v4464_v11  ;;  %v770_v11 = vld [vmem:[#allocation7 + $0xab0] sm:$0xff] }
 0x22d   :  { %4077 = vmatpush1.bf16.msra.mxu1 %v4466_v50  ;;  %3914 = vmatprep.subr.bf16.mxu0 %v4473_v51  ;;  %v767_v50 = vld [vmem:[#allocation7 + $0xa98] sm:$0xff]  ;;  %v4537_v58 = vcombine.high %v766_v0, %v770_v11 }
 0x22e   :  { %4078 = vmatprep.subr.bf16.mxu1 %v4475_v12  ;;  %v771_v51 = vld [vmem:[#allocation7 + $0xab8] sm:$0xff]  ;;  %v4528_v12 = vcombine.low %v758_v3, %v762_v53 }
 0x22f   :  { %v4539_v20 = vcombine.high %v767_v50, %v771_v51  ;;  %v4538_v34 = vcombine.low %v767_v50, %v771_v51  ;;  %v830_v50 = vld [vmem:[#allocation7 + $0xc90] sm:$0xff] }
 0x230   :  { %3915 = vmatpush1.bf16.msra.mxu0 %v4472_v14  ;;  %v778_v14 = vld [vmem:[#allocation7 + $0xaf0] sm:$0xff] }
 0x231   :  { %4079 = vmatpush1.bf16.msra.mxu1 %v4474_v40  ;;  %3916 = vmatprep.subr.bf16.mxu0 %v4481_v57  ;;  %v775_v40 = vld [vmem:[#allocation7 + $0xad8] sm:$0xff]  ;;  %v4545_v38 = vcombine.high %v774_v13, %v778_v14  ;;  %v834_v51 = vld [vmem:[#allocation7 + $0xcb0] sm:$0xff] }
 0x232   :  { %4080 = vmatprep.subr.bf16.mxu1 %v4483_v5  ;;  %v779_v57 = vld [vmem:[#allocation7 + $0xaf8] sm:$0xff]  ;;  %v4536_v5 = vcombine.low %v766_v0, %v770_v11 }
 0x233   :  { %v4547_v39 = vcombine.high %v775_v40, %v779_v57  ;;  %v4546_v16 = vcombine.low %v775_v40, %v779_v57  ;;  %v838_v57 = vld [vmem:[#allocation7 + $0xcd0] sm:$0xff] }
 0x234   :  { %3917 = vmatpush1.bf16.msra.mxu0 %v4480_v49  ;;  %v786_v49 = vld [vmem:[#allocation7 + $0xb30] sm:$0xff] }
 0x235   :  { %4081 = vmatpush1.bf16.msra.mxu1 %v4482_v36  ;;  %3918 = vmatprep.subr.bf16.mxu0 %v4489_v42  ;;  %v783_v36 = vld [vmem:[#allocation7 + $0xb18] sm:$0xff]  ;;  %v4553_v17 = vcombine.high %v782_v1, %v786_v49 }
 0x236   :  { %4082 = vmatprep.subr.bf16.mxu1 %v4491_v63  ;;  %v787_v42 = vld [vmem:[#allocation7 + $0xb38] sm:$0xff]  ;;  %v4544_v63 = vcombine.low %v774_v13, %v778_v14  ;;  %v4601_v14 = vcombine.high %v830_v50, %v834_v51 }
 0x237   :  { %v4555_v18 = vcombine.high %v783_v36, %v787_v42  ;;  %v4554_v54 = vcombine.low %v783_v36, %v787_v42  ;;  %v846_v36 = vld [vmem:[#allocation7 + $0xd10] sm:$0xff] }
 0x238   :  { %3919 = vmatpush1.bf16.msra.mxu0 %v4488_v21  ;;  %v794_v21 = vld [vmem:[#allocation7 + $0xb70] sm:$0xff] }
 0x239   :  { %4083 = vmatpush1.bf16.msra.mxu1 %v4490_v22  ;;  %3920 = vmatprep.subr.bf16.mxu0 %v4497_v9  ;;  %v791_v22 = vld [vmem:[#allocation7 + $0xb58] sm:$0xff]  ;;  %v4561_v55 = vcombine.high %v790_v19, %v794_v21  ;;  %v850_v42 = vld [vmem:[#allocation7 + $0xd30] sm:$0xff] }
 0x23a   :  { %4084 = vmatprep.subr.bf16.mxu1 %v4499_v23  ;;  %v795_v9 = vld [vmem:[#allocation7 + $0xb78] sm:$0xff]  ;;  %v4552_v23 = vcombine.low %v782_v1, %v786_v49 }
 0x23b   :  { %v4563_v56 = vcombine.high %v791_v22, %v795_v9  ;;  %v4562_v29 = vcombine.low %v791_v22, %v795_v9  ;;  %v858_v22 = vld [vmem:[#allocation7 + $0xd70] sm:$0xff]  ;;  %v855_v9 = vld [vmem:[#allocation7 + $0xd58] sm:$0xff] }
 0x23c   :  { %3921 = vmatpush1.bf16.msra.mxu0 %v4496_v24  ;;  %v802_v24 = vld [vmem:[#allocation7 + $0xbb0] sm:$0xff] }
 0x23d   :  { %4085 = vmatpush1.bf16.msra.mxu1 %v4498_v26  ;;  %3922 = vmatprep.subr.bf16.mxu0 %v4505_v27  ;;  %v799_v26 = vld [vmem:[#allocation7 + $0xb98] sm:$0xff]  ;;  %v4569_v48 = vcombine.high %v798_v59, %v802_v24 }
 0x23e   :  { %4086 = vmatprep.subr.bf16.mxu1 %v4507_v28  ;;  %v803_v27 = vld [vmem:[#allocation7 + $0xbb8] sm:$0xff]  ;;  %v4560_v28 = vcombine.low %v790_v19, %v794_v21  ;;  %v854_v21 = vld [vmem:[#allocation7 + $0xd50] sm:$0xff] }
 0x23f   :  { %v4571_v30 = vcombine.high %v799_v26, %v803_v27  ;;  %v4570_v37 = vcombine.low %v799_v26, %v803_v27  ;;  %v866_v26 = vld [vmem:[#allocation7 + $0xdb0] sm:$0xff]  ;;  %v863_v27 = vld [vmem:[#allocation7 + $0xd98] sm:$0xff] }
 0x240   :  { %3923 = vmatpush1.bf16.msra.mxu0 %v4504_v47  ;;  %v810_v47 = vld [vmem:[#allocation7 + $0xbf0] sm:$0xff] }
 0x241   :  { %4087 = vmatpush1.bf16.msra.mxu1 %v4506_v32  ;;  %3924 = vmatprep.subr.bf16.mxu0 %v4513_v45  ;;  %v807_v32 = vld [vmem:[#allocation7 + $0xbd8] sm:$0xff]  ;;  %v4577_v41 = vcombine.high %v806_v31, %v810_v47 }
 0x242   :  { %4088 = vmatprep.subr.bf16.mxu1 %v4515_v33  ;;  %v811_v45 = vld [vmem:[#allocation7 + $0xbf8] sm:$0xff]  ;;  %v4568_v33 = vcombine.low %v798_v59, %v802_v24  ;;  %v862_v24 = vld [vmem:[#allocation7 + $0xd90] sm:$0xff] }
 0x243   :  { %v4579_v44 = vcombine.high %v807_v32, %v811_v45  ;;  %v4578_v3 = vcombine.low %v807_v32, %v811_v45  ;;  %v870_v32 = vld [vmem:[#allocation7 + $0xdd0] sm:$0xff] }
 0x244   :  { %3925 = vmatpush1.bf16.msra.mxu0 %v4512_v46  ;;  %v818_v46 = vld [vmem:[#allocation7 + $0xc30] sm:$0xff] }
 0x245   :  { %4089 = vmatpush1.bf16.msra.mxu1 %v4514_v25  ;;  %3926 = vmatprep.subr.bf16.mxu0 %v4521_v62  ;;  %v815_v25 = vld [vmem:[#allocation7 + $0xc18] sm:$0xff]  ;;  %v4585_v53 = vcombine.high %v814_v60, %v818_v46  ;;  %v874_v45 = vld [vmem:[#allocation7 + $0xdf0] sm:$0xff] }
 0x246   :  { %4090 = vmatprep.subr.bf16.mxu1 %v4523_v2  ;;  %v819_v62 = vld [vmem:[#allocation7 + $0xc38] sm:$0xff]  ;;  %v4576_v2 = vcombine.low %v806_v31, %v810_v47 }
 0x247   :  { %v4587_v6 = vcombine.high %v815_v25, %v819_v62  ;;  %v4586_v0 = vcombine.low %v815_v25, %v819_v62 }
 0x248   :  { %3927 = vmatpush1.bf16.msra.mxu0 %v4520_v8  ;;  %v826_v8 = vld [vmem:[#allocation7 + $0xc70] sm:$0xff] }
 0x249   :  { %4091 = vmatpush1.bf16.msra.mxu1 %v4522_v4  ;;  %3928 = vmatprep.subr.bf16.mxu0 %v4529_v52  ;;  %v4584_v4 = vcombine.low %v814_v60, %v818_v46  ;;  %v823_v52 = vld [vmem:[#allocation7 + $0xc58] sm:$0xff]  ;;  %v4593_v11 = vcombine.high %v822_v7, %v826_v8 }
 0x24a   :  { %4092 = vmatprep.subr.bf16.mxu1 %v4531_v10  ;;  %v827_v10 = vld [vmem:[#allocation7 + $0xc78] sm:$0xff] }
 0x24b   :  { %v4594_v13 = vcombine.low %v823_v52, %v827_v10  ;;  %v875_v60 = vld [vmem:[#allocation7 + $0xdf8] sm:$0xff] }
 0x24c   :  { %3929 = vmatpush1.bf16.msra.mxu0 %v4528_v12  ;;  %v4595_v12 = vcombine.high %v823_v52, %v827_v10 }
 0x24d   :  { %4093 = vmatpush1.bf16.msra.mxu1 %v4530_v35  ;;  %3930 = vmatprep.subr.bf16.mxu0 %v4537_v58  ;;  %v831_v35 = vld [vmem:[#allocation7 + $0xc98] sm:$0xff] }
 0x24e   :  { %4094 = vmatprep.subr.bf16.mxu1 %v4539_v20  ;;  %v835_v58 = vld [vmem:[#allocation7 + $0xcb8] sm:$0xff]  ;;  %v4592_v20 = vcombine.low %v822_v7, %v826_v8 }
 0x24f   :  { %v4603_v40 = vcombine.high %v831_v35, %v835_v58 }
 0x250   :  { %3931 = vmatpush1.bf16.msra.mxu0 %v4536_v5  ;;  %v842_v5 = vld [vmem:[#allocation7 + $0xcf0] sm:$0xff] }
 0x251   :  { %4095 = vmatpush1.bf16.msra.mxu1 %v4538_v34  ;;  %3932 = vmatprep.subr.bf16.mxu0 %v4545_v38  ;;  %v839_v34 = vld [vmem:[#allocation7 + $0xcd8] sm:$0xff]  ;;  %v4609_v1 = vcombine.high %v838_v57, %v842_v5 }
 0x252   :  { %4096 = vmatprep.subr.bf16.mxu1 %v4547_v39  ;;  %v843_v38 = vld [vmem:[#allocation7 + $0xcf8] sm:$0xff]  ;;  %v4600_v39 = vcombine.low %v830_v50, %v834_v51 }
 0x253   :  { %v4611_v49 = vcombine.high %v839_v34, %v843_v38  ;;  %v879_v50 = vld [vmem:[#allocation7 + $0xe18] sm:$0xff] }
 0x254   :  { %3933 = vmatpush1.bf16.msra.mxu0 %v4544_v63  ;;  %v847_v63 = vld [vmem:[#allocation7 + $0xd18] sm:$0xff] }
 0x255   :  { %4097 = vmatpush1.bf16.msra.mxu1 %v4546_v16  ;;  %3934 = vmatprep.subr.bf16.mxu0 %v4553_v17  ;;  %v851_v16 = vld [vmem:[#allocation7 + $0xd38] sm:$0xff]  ;;  %v4610_v17 = vcombine.low %v839_v34, %v843_v38 }
 0x256   :  { %4098 = vmatprep.subr.bf16.mxu1 %v4555_v18  ;;  %v4617_v18 = vcombine.high %v846_v36, %v850_v42  ;;  %v4619_v19 = vcombine.high %v847_v63, %v851_v16  ;;  %v883_v51 = vld [vmem:[#allocation7 + $0xe38] sm:$0xff] }
 0x257   :  { %v4650_v34 = vcombine.low %v879_v50, %v883_v51 }
 0x258   :  { %3935 = vmatpush1.bf16.msra.mxu0 %v4552_v23  ;;  %v859_v23 = vld [vmem:[#allocation7 + $0xd78] sm:$0xff] }
 0x259   :  { %4099 = vmatpush1.bf16.msra.mxu1 %v4554_v54  ;;  %3936 = vmatprep.subr.bf16.mxu0 %v4561_v55  ;;  %v4616_v54 = vcombine.low %v846_v36, %v850_v42  ;;  %v4618_v55 = vcombine.low %v847_v63, %v851_v16  ;;  %v4627_v59 = vcombine.high %v855_v9, %v859_v23  ;;  %v899_v36 = vld [vmem:[#allocation7 + $0xeb8] sm:$0xff] }
 0x25a   :  { %4100 = vmatprep.subr.bf16.mxu1 %v4563_v56  ;;  %v4625_v56 = vcombine.high %v854_v21, %v858_v22 }
 0x25c   :  { %3937 = vmatpush1.bf16.msra.mxu0 %v4560_v28  ;;  %v867_v28 = vld [vmem:[#allocation7 + $0xdb8] sm:$0xff] }
 0x25d   :  { %4101 = vmatpush1.bf16.msra.mxu1 %v4562_v29  ;;  %3938 = vmatprep.subr.bf16.mxu0 %v4569_v48  ;;  %v4624_v29 = vcombine.low %v854_v21, %v858_v22  ;;  %v4626_v48 = vcombine.low %v855_v9, %v859_v23  ;;  %v4635_v47 = vcombine.high %v863_v27, %v867_v28  ;;  %v907_v21 = vld [vmem:[#allocation7 + $0xef8] sm:$0xff] }
 0x25e   :  { %4102 = vmatprep.subr.bf16.mxu1 %v4571_v30  ;;  %v4633_v30 = vcombine.high %v862_v24, %v866_v26  ;;  %v4634_v8 = vcombine.low %v863_v27, %v867_v28 }
 0x260   :  { %3939 = vmatpush1.bf16.msra.mxu0 %v4568_v33 }
 0x261   :  { %4103 = vmatpush1.bf16.msra.mxu1 %v4570_v37  ;;  %3940 = vmatprep.subr.bf16.mxu0 %v4577_v41 }
 0x262   :  { %4104 = vmatprep.subr.bf16.mxu1 %v4579_v44  ;;  %v871_v44 = vld [vmem:[#allocation7 + $0xdd8] sm:$0xff] }
 0x263   :  { %v4643_v10 = vcombine.high %v871_v44, %v875_v60 }
 0x264   :  { %3941 = vmatpush1.bf16.msra.mxu0 %v4576_v2 }
 0x265   :  { %4105 = vmatpush1.bf16.msra.mxu1 %v4578_v3  ;;  %3951 = vmatprep.subr.bf16.mxu0 %v4585_v53  ;;  %v4632_v3 = vcombine.low %v862_v24, %v866_v26  ;;  %v915_v24 = vld [vmem:[#allocation7 + $0xf38] sm:$0xff] }
 0x266   :  { %4115 = vmatprep.subr.bf16.mxu1 %v4587_v6 }
 0x267   :  { %3943 = vmatmul.mubr.bf16.vlgmr.msra.gmra.mrb[4].mxu0 %v5207_v43 }
 0x268   :  { %4107 = vmatmul.mubr.bf16.vlgmr.msra.gmra.mrb[4].mxu1 %v5207_v43  ;;  %3952 = vmatpush1.bf16.msra.mxu0 %v4584_v4  ;;  %v4602_v43 = vcombine.low %v831_v35, %v835_v58  ;;  %v4641_v4 = vcombine.high %v870_v32, %v874_v45  ;;  %v4642_v35 = vcombine.low %v871_v44, %v875_v60  ;;  %v930_v44 = vld [vmem:[#allocation7 + $0xfb0] sm:$0xff]  ;;  %v927_v60 = vld [vmem:[#allocation7 + $0xf98] sm:$0xff] }
 0x269   :  { %3983 = vmatprep.mubr.bf16.mxu0 %v5210_v61  ;;  %4116 = vmatpush1.bf16.msra.mxu1 %v4586_v0  ;;  %v878_v0 = vld [vmem:[#allocation7 + $0xe10] sm:$0xff] }
 0x26a   :  { %4147 = vmatprep.mubr.bf16.mxu1 %v5210_v61  ;;  %3953 = vmatprep.subr.bf16.mxu0 %v4593_v11  ;;  %v4608_v61 = vcombine.low %v838_v57, %v842_v5  ;;  %v882_v11 = vld [vmem:[#allocation7 + $0xe30] sm:$0xff]  ;;  %v891_v57 = vld [vmem:[#allocation7 + $0xe78] sm:$0xff] }
 0x26b   :  { %4117 = vmatprep.subr.bf16.mxu1 %v4595_v12  ;;  %v4640_v12 = vcombine.low %v870_v32, %v874_v45  ;;  %v4649_v58 = vcombine.high %v878_v0, %v882_v11  ;;  %v4648_v5 = vcombine.low %v878_v0, %v882_v11 }
 0x26c   :  { %3954 = vmatpush1.bf16.msra.mxu0 %v4592_v20  ;;  %v4651_v20 = vcombine.high %v879_v50, %v883_v51 }
 0x26d   :  { %4118 = vmatpush1.bf16.msra.mxu1 %v4594_v13  ;;  %3955 = vmatprep.subr.bf16.mxu0 %v4601_v14  ;;  %v886_v13 = vld [vmem:[#allocation7 + $0xe50] sm:$0xff] }
 0x26e   :  { %4119 = vmatprep.subr.bf16.mxu1 %v4603_v40  ;;  %v890_v14 = vld [vmem:[#allocation7 + $0xe70] sm:$0xff]  ;;  %v887_v40 = vld [vmem:[#allocation7 + $0xe58] sm:$0xff] }
 0x26f   :  { %v4657_v38 = vcombine.high %v886_v13, %v890_v14  ;;  %v4656_v42 = vcombine.low %v886_v13, %v890_v14  ;;  %v4658_v63 = vcombine.low %v887_v40, %v891_v57 }
 0x270   :  { %3956 = vmatpush1.bf16.msra.mxu0 %v4600_v39  ;;  %v4659_v39 = vcombine.high %v887_v40, %v891_v57 }
 0x271   :  { %4120 = vmatpush1.bf16.msra.mxu1 %v4602_v43  ;;  %3957 = vmatprep.subr.bf16.mxu0 %v4609_v1  ;;  %v894_v43 = vld [vmem:[#allocation7 + $0xe90] sm:$0xff] }
 0x272   :  { %4121 = vmatprep.subr.bf16.mxu1 %v4611_v49  ;;  %v898_v1 = vld [vmem:[#allocation7 + $0xeb0] sm:$0xff]  ;;  %v895_v49 = vld [vmem:[#allocation7 + $0xe98] sm:$0xff] }
 0x273   :  { %v4665_v16 = vcombine.high %v894_v43, %v898_v1  ;;  %v4664_v22 = vcombine.low %v894_v43, %v898_v1  ;;  %v4666_v9 = vcombine.low %v895_v49, %v899_v36 }
 0x274   :  { %3958 = vmatpush1.bf16.msra.mxu0 %v4608_v61  ;;  %v4667_v61 = vcombine.high %v895_v49, %v899_v36 }
 0x275   :  { %4122 = vmatpush1.bf16.msra.mxu1 %v4610_v17  ;;  %3959 = vmatprep.subr.bf16.mxu0 %v4617_v18  ;;  %v902_v17 = vld [vmem:[#allocation7 + $0xed0] sm:$0xff] }
 0x276   :  { %4123 = vmatprep.subr.bf16.mxu1 %v4619_v19  ;;  %v906_v18 = vld [vmem:[#allocation7 + $0xef0] sm:$0xff]  ;;  %v903_v19 = vld [vmem:[#allocation7 + $0xed8] sm:$0xff] }
 0x277   :  { %v4673_v23 = vcombine.high %v902_v17, %v906_v18  ;;  %v4672_v26 = vcombine.low %v902_v17, %v906_v18  ;;  %v4674_v27 = vcombine.low %v903_v19, %v907_v21 }
 0x278   :  { %3960 = vmatpush1.bf16.msra.mxu0 %v4616_v54  ;;  %v4675_v54 = vcombine.high %v903_v19, %v907_v21 }
 0x279   :  { %4124 = vmatpush1.bf16.msra.mxu1 %v4618_v55  ;;  %3961 = vmatprep.subr.bf16.mxu0 %v4625_v56  ;;  %v910_v55 = vld [vmem:[#allocation7 + $0xf10] sm:$0xff] }
 0x27a   :  { %v3657_v31 = vpop.f32.mrb[0].mxu0  ;;  %4125 = vmatprep.subr.bf16.mxu1 %v4627_v59  ;;  %v914_v56 = vld [vmem:[#allocation7 + $0xf30] sm:$0xff]  ;;  %v911_v59 = vld [vmem:[#allocation7 + $0xf18] sm:$0xff] }
 0x27b   :  { %v4156_v33 = vmax.f32 %v3657_v31, 0.0  ;;  %v3821_v37 = vpop.f32.mrb[0].mxu1  ;;  %v3659_v41 = vpop.f32.mrb[1].mxu0  ;;  %v4681_v28 = vcombine.high %v910_v55, %v914_v56  ;;  %v919_v31 = vld [vmem:[#allocation7 + $0xf58] sm:$0xff]  ;;  %v4680_v32 = vcombine.low %v910_v55, %v914_v56  ;;  %v4682_v45 = vcombine.low %v911_v59, %v915_v24 }
 0x27c   :  { %v4158_v46 = vmax.f32 %v3821_v37, 0.0  ;;  %v4157_v25 = vmax.f32 %v3659_v41, 0.0  ;;  %v3823_v62 = vpop.f32.mrb[1].mxu1  ;;  %v3661_v2 = vpop.f32.mrb[2].mxu0  ;;  %3962 = vmatpush1.bf16.msra.mxu0 %v4624_v29  ;;  %v4683_v29 = vcombine.high %v911_v59, %v915_v24  ;;  %v926_v41 = vld [vmem:[#allocation7 + $0xf90] sm:$0xff] }
 0x27d   :  { %4164 = vst [vmem:[#allocation8] sm:$0xff] %v4156_v33  ;;  %v4159_v53 = vmax.f32 %v3823_v62, 0.0  ;;  %v3825_v6 = vpop.f32.mrb[2].mxu1  ;;  %4126 = vmatpush1.bf16.msra.mxu1 %v4626_v48  ;;  %v3662_v7 = vpop.f32.mrb[3].mxu0  ;;  %3963 = vmatprep.subr.bf16.mxu0 %v4633_v30  ;;  %v918_v48 = vld [vmem:[#allocation7 + $0xf50] sm:$0xff]  ;;  %v4697_v2 = vcombine.high %v926_v41, %v930_v44 }
 0x27e   :  { %4166 = vst [vmem:[#allocation8 + $0x10] sm:$0xff] %v4158_v46  ;;  %4165 = vst [vmem:[#allocation8 + $0x8] sm:$0xff] %v4157_v25  ;;  %v3826_v52 = vpop.f32.mrb[3].mxu1  ;;  %4127 = vmatprep.subr.bf16.mxu1 %v4635_v47  ;;  %v922_v30 = vld [vmem:[#allocation7 + $0xf70] sm:$0xff]  ;;  %v923_v47 = vld [vmem:[#allocation7 + $0xf78] sm:$0xff] }
 0x27f   :  { %4167 = vst [vmem:[#allocation8 + $0x18] sm:$0xff] %v4159_v53  ;;  %v4689_v33 = vcombine.high %v918_v48, %v922_v30  ;;  %v4691_v37 = vcombine.high %v919_v31, %v923_v47  ;;  %v931_v46 = vld [vmem:[#allocation7 + $0xfb8] sm:$0xff]  ;;  %v4688_v25 = vcombine.low %v918_v48, %v922_v30  ;;  %v4690_v62 = vcombine.low %v919_v31, %v923_v47  ;;  %v934_v53 = vld [vmem:[#allocation7 + $0xfd0] sm:$0xff] }
 0x280   :  { %3964 = vmatpush1.bf16.msra.mxu0 %v4632_v3  ;;  %v4699_v3 = vcombine.high %v927_v60, %v931_v46  ;;  %v938_v6 = vld [vmem:[#allocation7 + $0xff0] sm:$0xff]  ;;  %v935_v7 = vld [vmem:[#allocation7 + $0xfd8] sm:$0xff]  ;;  %v4698_v52 = vcombine.low %v927_v60, %v931_v46 }
 0x281   :  { %4128 = vmatpush1.bf16.msra.mxu1 %v4634_v8  ;;  %3965 = vmatprep.subr.bf16.mxu0 %v4641_v4  ;;  %v939_v8 = vld [vmem:[#allocation7 + $0xff8] sm:$0xff]  ;;  %v4696_v4 = vcombine.low %v926_v41, %v930_v44  ;;  %v4704_v11 = vcombine.low %v934_v53, %v938_v6 }
 0x282   :  { %4129 = vmatprep.subr.bf16.mxu1 %v4643_v10  ;;  %v4705_v10 = vcombine.high %v934_v53, %v938_v6  ;;  %v4707_v0 = vcombine.high %v935_v7, %v939_v8  ;;  %v4706_v50 = vcombine.low %v935_v7, %v939_v8 }
 0x284   :  { %3966 = vmatpush1.bf16.msra.mxu0 %v4640_v12 }
 0x285   :  { %4130 = vmatpush1.bf16.msra.mxu1 %v4642_v35  ;;  %3967 = vmatprep.subr.bf16.mxu0 %v4649_v58 }
 0x286   :  { %4131 = vmatprep.subr.bf16.mxu1 %v4651_v20 }
 0x288   :  { %3968 = vmatpush1.bf16.msra.mxu0 %v4648_v5 }
 0x289   :  { %4132 = vmatpush1.bf16.msra.mxu1 %v4650_v34  ;;  %3969 = vmatprep.subr.bf16.mxu0 %v4657_v38 }
 0x28a   :  { %4133 = vmatprep.subr.bf16.mxu1 %v4659_v39 }
 0x28c   :  { %3970 = vmatpush1.bf16.msra.mxu0 %v4656_v42 }
 0x28d   :  { %4134 = vmatpush1.bf16.msra.mxu1 %v4658_v63  ;;  %3971 = vmatprep.subr.bf16.mxu0 %v4665_v16 }
 0x28e   :  { %4135 = vmatprep.subr.bf16.mxu1 %v4667_v61 }
 0x290   :  { %3972 = vmatpush1.bf16.msra.mxu0 %v4664_v22 }
 0x291   :  { %4136 = vmatpush1.bf16.msra.mxu1 %v4666_v9  ;;  %3973 = vmatprep.subr.bf16.mxu0 %v4673_v23 }
 0x292   :  { %4137 = vmatprep.subr.bf16.mxu1 %v4675_v54 }
 0x294   :  { %3974 = vmatpush1.bf16.msra.mxu0 %v4672_v26 }
 0x295   :  { %4138 = vmatpush1.bf16.msra.mxu1 %v4674_v27  ;;  %3975 = vmatprep.subr.bf16.mxu0 %v4681_v28 }
 0x296   :  { %4139 = vmatprep.subr.bf16.mxu1 %v4683_v29 }
 0x298   :  { %3976 = vmatpush1.bf16.msra.mxu0 %v4680_v32 }
 0x299   :  { %4140 = vmatpush1.bf16.msra.mxu1 %v4682_v45  ;;  %3977 = vmatprep.subr.bf16.mxu0 %v4689_v33 }
 0x29a   :  { %4141 = vmatprep.subr.bf16.mxu1 %v4691_v37 }
 0x29c   :  { %3978 = vmatpush1.bf16.msra.mxu0 %v4688_v25 }
 0x29d   :  { %4142 = vmatpush1.bf16.msra.mxu1 %v4690_v62  ;;  %3979 = vmatprep.subr.bf16.mxu0 %v4697_v2 }
 0x29e   :  { %4143 = vmatprep.subr.bf16.mxu1 %v4699_v3 }
 0x2a0   :  { %3980 = vmatpush1.bf16.msra.mxu0 %v4696_v4 }
 0x2a1   :  { %4144 = vmatpush1.bf16.msra.mxu1 %v4698_v52  ;;  %3981 = vmatprep.subr.bf16.mxu0 %v4705_v10 }
 0x2a2   :  { %4145 = vmatprep.subr.bf16.mxu1 %v4707_v0 }
 0x2a4   :  { %3982 = vmatpush1.bf16.msra.mxu0 %v4704_v11 }
 0x2a5   :  { %4146 = vmatpush1.bf16.msra.mxu1 %v4706_v50 }
 0x2a7   :  { %3984 = vmatmul.mubr.bf16.vlgmr.msra.gmra.mrb[4].mxu0 %v5216_v15 }
 0x2a8   :  { %4148 = vmatmul.mubr.bf16.vlgmr.msra.gmra.mrb[4].mxu1 %v5216_v15 }
 0x37a   :  { %v3985_v51 = vpop.f32.mrb[4].mxu0 }
 0x37b   :  { %v4160_v12 = vmax.f32 %v3985_v51, 0.0  ;;  %v4149_v35 = vpop.f32.mrb[4].mxu1  ;;  %v3987_v58 = vpop.f32.mrb[5].mxu0 }
 0x37c   :  { %v4162_v20 = vmax.f32 %v4149_v35, 0.0  ;;  %v4161_v13 = vmax.f32 %v3987_v58, 0.0  ;;  %v4151_v14 = vpop.f32.mrb[5].mxu1  ;;  %v3989_v40 = vpop.f32.mrb[6].mxu0 }
 0x37d   :  { %4168 = vst [vmem:[#allocation8 + $0x20] sm:$0xff] %v4160_v12  ;;  %v4163_v57 = vmax.f32 %v4151_v14, 0.0  ;;  %v4153_v5 = vpop.f32.mrb[6].mxu1  ;;  %v3990_v34 = vpop.f32.mrb[7].mxu0 }
 0x37e   :  { %4170 = vst [vmem:[#allocation8 + $0x30] sm:$0xff] %v4162_v20  ;;  %4169 = vst [vmem:[#allocation8 + $0x28] sm:$0xff] %v4161_v13  ;;  %v4154_v38 = vpop.f32.mrb[7].mxu1 }
 0x37f   :  { %4171 = vst [vmem:[#allocation8 + $0x38] sm:$0xff] %v4163_v57 }
 0x380   :  { %4881 = shalt.err (!%p4878_p0)
}
 0x381   :  { %s4882_s10 = scalar_lea.hbm %s5253_s5, 1024 }
 0x382   :  { %p4883_p1 = scmp.ne.s32.totalorder %s5253_s5, %s4882_s10  ;;  %p4886_p2 = scmp.lt.u32.totalorder %s4882_s10, %s5253_s5 }
 0x384   :  { %p4888_p3 = pnand %p4886_p2, %p4883_p1 }
 0x386   :  { %4891 = shalt.err (!%p4888_p3)
}
 0x387   :  { %4181 = dma.vmem_to_hbm [thread:$0]  %s4179_s6, 1024, %s5253_s5, [#allocation4]  }
 0x388   :  { %4896 = dma.done.wait [#allocation4], 1024  }
 0x389   :  { %4897 = vsyncadd [#allocation4], 4294966272 }
 0x38a   :  { %4185 = vsyncpa [#allocation3], 1 }
 0x38b   :  { %4186 = vsyncpa [#allocation6], 1 }
 0x38c   :  { %4187 = vsyncpa [#allocation4], 1 }

</bundles_post_ra>
